<compile_context>
chip_gen: v7x
topology: tpu7x:2x2x1
jax: 0.10.0
libtpu: 0.0.40
codegen_flags: <defaults>
</compile_context>

<pallas_src>
from functools import partial

import jax
import jax.numpy as jnp
from jax.experimental import pallas as pl
from jax.experimental.pallas import tpu as pltpu

_VMEM_LIMIT = 32 * 1024 * 1024  # safe on v5e/v6e/v7x


# ----------------------------------------------------------------------------
# Pallas kernel 1: group normalization  (x -> (x - mean) / std, unbiased std)
# ----------------------------------------------------------------------------
def group_norm_kernel(x_ref, y_ref, mean_ref, std_ref):
    # x_ref: (G, M)   y_ref: (G, M)   mean_ref/std_ref: (G, 1)
    x = x_ref[...].astype(jnp.float32)
    m = x.shape[-1]
    mean = jnp.mean(x, axis=-1, keepdims=True)                       # (G, 1)
    centered = x - mean
    var = jnp.sum(centered * centered, axis=-1, keepdims=True) * (1.0 / (m - 1))
    std = jnp.sqrt(var)
    inv_std = 1.0 / std                                              # tiny: (G,1) divide only
    y_ref[...] = (centered * inv_std).astype(y_ref.dtype)
    mean_ref[...] = mean.astype(mean_ref.dtype)
    std_ref[...] = std.astype(std_ref.dtype)


def group_norm(x, num_groups):
    B, C, H, W = x.shape
    G = num_groups
    M = (C // G) * H * W
    x3 = x.reshape(B, G, M)
    y, mean, std = pl.pallas_call(
        group_norm_kernel,
        grid=(B,),
        in_specs=[pl.BlockSpec((None, G, M), lambda b: (b, 0, 0))],
        out_specs=(
            pl.BlockSpec((None, G, M), lambda b: (b, 0, 0)),
            pl.BlockSpec((None, G, 1), lambda b: (b, 0, 0)),
            pl.BlockSpec((None, G, 1), lambda b: (b, 0, 0)),
        ),
        out_shape=(
            jax.ShapeDtypeStruct((B, G, M), x.dtype),
            jax.ShapeDtypeStruct((B, G, 1), jnp.float32),
            jax.ShapeDtypeStruct((B, G, 1), jnp.float32),
        ),
        compiler_params=pltpu.CompilerParams(
            dimension_semantics=("parallel",), vmem_limit_bytes=_VMEM_LIMIT),
    )(x3)
    return y.reshape(B, C, H, W), mean, std


# ----------------------------------------------------------------------------
# Pallas kernel 2: fused GRU cell (1x1-conv gates + gating + next-layer ReLU)
#   update = sigmoid(Wu [h; s] + bu)
#   reset  = sigmoid(Wr [h; s] + br)
#   delta  = tanh  (Wo [h; s*reset] + bo)
#   new_s  = s * (1 - update) + delta * update ; also emits relu(new_s)
#
# Weights are pre-stacked/split in the wrapper:
#   Wur_x / Wur_s : (2Ch, Ch)  -> update+reset computed with TWO matmuls total
#   Wo_x  / Wo_s  : (Ch,  Ch)
# so there is no in-kernel transpose and no in-kernel concatenation.
# ----------------------------------------------------------------------------
def gru_cell_kernel(h_ref, s_ref, wurx_ref, wurs_ref, wox_ref, wos_ref,
                    bur_ref, bo_ref, state_ref, relu_ref):
    h = h_ref[...].astype(jnp.float32)      # (Ch, T)
    s = s_ref[...].astype(jnp.float32)      # (Ch, T)
    ch = h.shape[0]

    # update + reset gates in one shot: (2Ch, Ch) @ (Ch, T) x2 + bias
    z = jnp.dot(wurx_ref[...].astype(jnp.float32), h,
                preferred_element_type=jnp.float32)
    z = z + jnp.dot(wurs_ref[...].astype(jnp.float32), s,
                    preferred_element_type=jnp.float32)
    z = z + bur_ref[...].astype(jnp.float32)            # (2Ch, 1) broadcast over lanes
    update = jax.nn.sigmoid(z[:ch, :])
    reset = jax.nn.sigmoid(z[ch:, :])

    sr = s * reset
    zo = jnp.dot(wox_ref[...].astype(jnp.float32), h,
                 preferred_element_type=jnp.float32)
    zo = zo + jnp.dot(wos_ref[...].astype(jnp.float32), sr,
                      preferred_element_type=jnp.float32)
    delta = jnp.tanh(zo + bo_ref[...].astype(jnp.float32))

    new_state = s * (1.0 - update) + delta * update
    state_ref[...] = new_state.astype(state_ref.dtype)
    relu_ref[...] = jnp.maximum(new_state, 0.0).astype(relu_ref.dtype)


def _pick_tile(hw, max_tile=2048):
    """Largest multiple of 128 that divides hw and is <= max_tile, else full hw."""
    if hw % 128 == 0:
        t = min(hw, max_tile)
        while t >= 128:
            if hw % t == 0:
                return t
            t -= 128
    return hw


def gru_cell(h, s, w_update, b_update, w_reset, b_reset, w_out, b_out):
    B, Ch, H, W = h.shape
    HW = H * W
    hf = h.reshape(B, Ch, HW)
    sf = s.reshape(B, Ch, HW)
    thw = _pick_tile(HW)
    n_t = HW // thw

    # stack update+reset (each (Ch, 2Ch)) -> (2Ch, 2Ch); split x-part / state-part
    wur = jnp.concatenate([w_update, w_reset], axis=0)          # (2Ch, 2Ch)
    wurx, wurs = wur[:, :Ch], wur[:, Ch:]                       # (2Ch, Ch) each
    bur = jnp.concatenate([b_update, b_reset], axis=0).reshape(2 * Ch, 1).astype(jnp.float32)
    wox, wos = w_out[:, :Ch], w_out[:, Ch:]                     # (Ch, Ch) each
    bo = b_out.reshape(Ch, 1).astype(jnp.float32)

    data_spec = pl.BlockSpec((None, Ch, thw), lambda b, t: (b, 0, t))
    wur_spec = pl.BlockSpec((2 * Ch, Ch), lambda b, t: (0, 0))
    wo_spec = pl.BlockSpec((Ch, Ch), lambda b, t: (0, 0))
    bur_spec = pl.BlockSpec((2 * Ch, 1), lambda b, t: (0, 0))
    bo_spec = pl.BlockSpec((Ch, 1), lambda b, t: (0, 0))

    new_state, relu_state = pl.pallas_call(
        gru_cell_kernel,
        grid=(B, n_t),
        in_specs=[data_spec, data_spec,
                  wur_spec, wur_spec, wo_spec, wo_spec,
                  bur_spec, bo_spec],
        out_specs=(data_spec, data_spec),
        out_shape=(jax.ShapeDtypeStruct((B, Ch, HW), h.dtype),
                   jax.ShapeDtypeStruct((B, Ch, HW), h.dtype)),
        compiler_params=pltpu.CompilerParams(
            dimension_semantics=("parallel", "parallel"),
            vmem_limit_bytes=_VMEM_LIMIT),
    )(hf, sf, wurx, wurs, wox, wos, bur, bo)
    return new_state.reshape(B, Ch, H, W), relu_state.reshape(B, Ch, H, W)


# ----------------------------------------------------------------------------
# Pallas kernel 3: un-normalization  (x * std + mean per group)
# ----------------------------------------------------------------------------
def unnorm_kernel(x_ref, mean_ref, std_ref, y_ref):
    x = x_ref[...].astype(jnp.float32)            # (G, M)
    y = x * std_ref[...].astype(jnp.float32) + mean_ref[...].astype(jnp.float32)
    y_ref[...] = y.astype(y_ref.dtype)


def unnorm(x, mean, std, num_groups):
    B, C, H, W = x.shape
    G = num_groups
    M = (C // G) * H * W
    x3 = x.reshape(B, G, M)
    y = pl.pallas_call(
        unnorm_kernel,
        grid=(B,),
        in_specs=[pl.BlockSpec((None, G, M), lambda b: (b, 0, 0)),
                  pl.BlockSpec((None, G, 1), lambda b: (b, 0, 0)),
                  pl.BlockSpec((None, G, 1), lambda b: (b, 0, 0))],
        out_specs=pl.BlockSpec((None, G, M), lambda b: (b, 0, 0)),
        out_shape=jax.ShapeDtypeStruct((B, G, M), x.dtype),
        compiler_params=pltpu.CompilerParams(
            dimension_semantics=("parallel",), vmem_limit_bytes=_VMEM_LIMIT),
    )(x3, mean, std)
    return y.reshape(B, C, H, W)


# ----------------------------------------------------------------------------
# Conv blocks (replication padding + 5x5 / dilated 3x3 conv) -- plain JAX/XLA.
# ----------------------------------------------------------------------------
def conv_block(x, w, b, pad, dilation):
    xp = jnp.pad(x, ((0, 0), (0, 0), (pad, pad), (pad, pad)), mode="edge")
    y = jax.lax.conv_general_dilated(
        xp, w, window_strides=(1, 1), padding="VALID",
        rhs_dilation=(dilation, dilation),
        dimension_numbers=("NCHW", "OIHW", "NCHW"))
    return y + b[None, :, None, None]


# ----------------------------------------------------------------------------
# Full NormConv2dGRU forward (Pallas path); conv_cfg is a static hashable tuple
# ((pad, dilation), ...) so the whole forward can be jitted.
# ----------------------------------------------------------------------------
@partial(jax.jit, static_argnums=(3, 4))
def norm_conv2d_gru_forward(x, prev_state, params, conv_cfg, num_groups):
    num_layers = len(params["gate_w_update"])
    xn, mean, std = group_norm(x, num_groups)

    cell = xn
    new_states = []
    for idx in range(num_layers):
        pad, dilation = conv_cfg[idx]
        cell = jax.nn.relu(conv_block(cell, params["conv_w"][idx], params["conv_b"][idx],
                                      pad, dilation))
        s = prev_state[..., idx]
        new_s, cell = gru_cell(
            cell, s,
            params["gate_w_update"][idx], params["gate_b_update"][idx],
            params["gate_w_reset"][idx], params["gate_b_reset"][idx],
            params["gate_w_out"][idx], params["gate_b_out"][idx])
        new_states.append(new_s)

    pad, dilation = conv_cfg[num_layers]
    out = conv_block(cell, params["conv_w"][num_layers], params["conv_b"][num_layers],
                     pad, dilation)
    out = unnorm(out, mean, std, num_groups)
    return out, jnp.stack(new_states, axis=-1)


# ----------------------------------------------------------------------------
# Plain-JAX reference (same conv_block; norm / GRU gates / unnorm in pure jnp)
# ----------------------------------------------------------------------------
def reference_forward(x, prev_state, params, conv_cfg, num_groups):
    B, C, H, W = x.shape
    num_layers = len(params["gate_w_update"])
    xg = x.reshape(B, num_groups, -1)
    mean = jnp.mean(xg, axis=-1, keepdims=True)
    std = jnp.std(xg, axis=-1, keepdims=True, ddof=1)   # unbiased, matches torch.std
    cell = ((xg - mean) / std).reshape(B, C, H, W)

    def conv1x1(w, b, t):
        return jnp.einsum("oc,bchw->bohw", w, t) + b[None, :, None, None]

    new_states = []
    for idx in range(num_layers):
        pad, dilation = conv_cfg[idx]
        cell = jax.nn.relu(conv_block(cell, params["conv_w"][idx], params["conv_b"][idx],
                                      pad, dilation))
        s = prev_state[..., idx]
        stacked = jnp.concatenate([cell, s], axis=1)
        update = jax.nn.sigmoid(conv1x1(params["gate_w_update"][idx],
                                        params["gate_b_update"][idx], stacked))
        reset = jax.nn.sigmoid(conv1x1(params["gate_w_reset"][idx],
                                       params["gate_b_reset"][idx], stacked))
        stacked2 = jnp.concatenate([cell, s * reset], axis=1)
        delta = jnp.tanh(conv1x1(params["gate_w_out"][idx],
                                 params["gate_b_out"][idx], stacked2))
        new_s = s * (1.0 - update) + delta * update
        new_states.append(new_s)
        cell = jax.nn.relu(new_s)

    pad, dilation = conv_cfg[num_layers]
    out = conv_block(cell, params["conv_w"][num_layers], params["conv_b"][num_layers],
                     pad, dilation)
    og = out.reshape(B, num_groups, -1)
    out = (og * std + mean).reshape(out.shape)
    return out, jnp.stack(new_states, axis=-1)


if __name__ == "__main__":
    # Keep Pallas (Mosaic) matmuls and the XLA reference on the same (full f32) path.
    jax.config.update("jax_default_matmul_precision", "highest")

    key = jax.random.PRNGKey(0)
    B, Cin, H, W = 2, 4, 16, 16
    hidden = 32
    num_layers = 2
    norm_groups = 2
    Cout = Cin  # out_channels=None -> in_channels

    keys = jax.random.split(key, 32)
    ki = iter(keys)

    x = jax.random.normal(next(ki), (B, Cin, H, W), jnp.float32)
    prev_state = 0.5 * jax.random.normal(next(ki), (B, hidden, H, W, num_layers), jnp.float32)

    # conv blocks: (in_ch, out_ch, kernel, dilation, replication-pad)
    conv_defs = [
        (Cin, hidden, 5, 1, 2),     # idx 0
        (hidden, hidden, 3, 2, 2),  # idx 1 (dilated)
        (hidden, Cout, 3, 1, 1),    # final
    ]
    conv_w, conv_b = [], []
    conv_cfg = []
    for (ic, oc, k, dil, pad) in conv_defs:
        conv_w.append(jax.random.normal(next(ki), (oc, ic, k, k), jnp.float32)
                      * ((ic * k * k) ** -0.5))
        conv_b.append(0.1 * jax.random.normal(next(ki), (oc,), jnp.float32))
        conv_cfg.append((pad, dil))
    conv_cfg = tuple(conv_cfg)   # static / hashable for jit

    # GRU gate weights: 1x1 convs (hidden, 2*hidden) squeezed to 2-D; bias per orthogonal init.
    gw_u, gb_u, gw_r, gb_r, gw_o, gb_o = [], [], [], [], [], []
    for _ in range(num_layers):
        scale = (2 * hidden) ** -0.5
        gw_u.append(jax.random.normal(next(ki), (hidden, 2 * hidden), jnp.float32) * scale)
        gb_u.append(jnp.zeros((hidden,), jnp.float32))
        gw_r.append(jax.random.normal(next(ki), (hidden, 2 * hidden), jnp.float32) * scale)
        gb_r.append(jnp.full((hidden,), -1.0, jnp.float32))
        gw_o.append(jax.random.normal(next(ki), (hidden, 2 * hidden), jnp.float32) * scale)
        gb_o.append(jnp.zeros((hidden,), jnp.float32))

    params = {
        "conv_w": conv_w, "conv_b": conv_b,
        "gate_w_update": gw_u, "gate_b_update": gb_u,
        "gate_w_reset": gw_r, "gate_b_reset": gb_r,
        "gate_w_out": gw_o, "gate_b_out": gb_o,
    }

    out, new_states = norm_conv2d_gru_forward(x, prev_state, params, conv_cfg, norm_groups)
    out = jax.block_until_ready(out)
    new_states = jax.block_until_ready(new_states)

    ref_out, ref_states = reference_forward(x, prev_state, params, conv_cfg, norm_groups)

    assert out.shape == (B, Cout, H, W)
    assert new_states.shape == (B, hidden, H, W, num_layers)
    assert jnp.allclose(out, ref_out, atol=1e-2, rtol=1e-2), "output mismatch vs reference"
    assert jnp.allclose(new_states, ref_states, atol=1e-2, rtol=1e-2), "state mismatch vs reference"

    print("KERNEL_OK")
</pallas_src>

<mosaic_0001>
module attributes {stable_mosaic.version = 11 : i64} {
  func.func @group_norm_kernel(%arg0: i32, %arg1: memref<1x2x512xf32, #tpu.memory_space<vmem>>, %arg2: memref<1x2x512xf32, #tpu.memory_space<vmem>>, %arg3: memref<1x2x1xf32, #tpu.memory_space<vmem>>, %arg4: memref<1x2x1xf32, #tpu.memory_space<vmem>>) attributes {dimension_semantics = [#tpu.dimension_semantics<parallel>], iteration_bounds = array<i64: 2>, scalar_prefetch = 0 : i64, scratch_operands = 0 : i64, tpu.core_type = #tpu.core_type<tc>, window_params = [{transform_indices = @transform_0, window_bounds = array<i64: 1, 2, 512>}, {transform_indices = @transform_1, window_bounds = array<i64: 1, 2, 512>}, {transform_indices = @transform_2, window_bounds = array<i64: 1, 2, 1>}, {transform_indices = @transform_3, window_bounds = array<i64: 1, 2, 1>}]} {
    %c0 = arith.constant 0 : index
    %c0_0 = arith.constant 0 : index
    %c0_1 = arith.constant 0 : index
    %0 = vector.load %arg1[%c0, %c0_0, %c0_1] : memref<1x2x512xf32, #tpu.memory_space<vmem>>, vector<1x2x512xf32>
    %1 = vector.shape_cast %0 : vector<1x2x512xf32> to vector<2x512xf32>
    %cst = arith.constant dense<0.000000e+00> : vector<2xf32>
    %2 = vector.multi_reduction <add>, %1, %cst [1] : vector<2x512xf32> to vector<2xf32>
    %3 = vector.shape_cast %2 : vector<2xf32> to vector<2x1xf32>
    %cst_2 = arith.constant 5.120000e+02 : f32
    %4 = vector.broadcast %cst_2 : f32 to vector<2x1xf32>
    %5 = arith.divf %3, %4 : vector<2x1xf32>
    %6 = vector.broadcast %5 : vector<2x1xf32> to vector<2x512xf32>
    %7 = arith.subf %1, %6 : vector<2x512xf32>
    %8 = arith.mulf %7, %7 : vector<2x512xf32>
    %cst_3 = arith.constant dense<0.000000e+00> : vector<2xf32>
    %9 = vector.multi_reduction <add>, %8, %cst_3 [1] : vector<2x512xf32> to vector<2xf32>
    %10 = vector.shape_cast %9 : vector<2xf32> to vector<2x1xf32>
    %cst_4 = arith.constant 0.00195694715 : f32
    %11 = vector.broadcast %cst_4 : f32 to vector<2x1xf32>
    %12 = arith.mulf %10, %11 : vector<2x1xf32>
    %13 = math.sqrt %12 : vector<2x1xf32>
    %cst_5 = arith.constant 1.000000e+00 : f32
    %14 = vector.broadcast %cst_5 : f32 to vector<2x1xf32>
    %15 = arith.divf %14, %13 : vector<2x1xf32>
    %16 = vector.broadcast %15 : vector<2x1xf32> to vector<2x512xf32>
    %17 = arith.mulf %7, %16 : vector<2x512xf32>
    %c0_6 = arith.constant 0 : index
    %c0_7 = arith.constant 0 : index
    %c0_8 = arith.constant 0 : index
    %18 = vector.load %arg2[%c0_6, %c0_7, %c0_8] : memref<1x2x512xf32, #tpu.memory_space<vmem>>, vector<1x2x512xf32>
    %19 = vector.shape_cast %18 : vector<1x2x512xf32> to vector<2x512xf32>
    %20 = vector.shape_cast %17 : vector<2x512xf32> to vector<1x2x512xf32>
    tpu.vector_store %arg2[%c0_6, %c0_7, %c0_8], %20 {strides = array<i32>} : memref<1x2x512xf32, #tpu.memory_space<vmem>>, vector<1x2x512xf32>,
    %c0_9 = arith.constant 0 : index
    %c0_10 = arith.constant 0 : index
    %c0_11 = arith.constant 0 : index
    %21 = vector.load %arg3[%c0_9, %c0_10, %c0_11] : memref<1x2x1xf32, #tpu.memory_space<vmem>>, vector<1x2x1xf32>
    %22 = vector.shape_cast %21 : vector<1x2x1xf32> to vector<2x1xf32>
    %23 = vector.shape_cast %5 : vector<2x1xf32> to vector<1x2x1xf32>
    tpu.vector_store %arg3[%c0_9, %c0_10, %c0_11], %23 {strides = array<i32>} : memref<1x2x1xf32, #tpu.memory_space<vmem>>, vector<1x2x1xf32>,
    %c0_12 = arith.constant 0 : index
    %c0_13 = arith.constant 0 : index
    %c0_14 = arith.constant 0 : index
    %24 = vector.load %arg4[%c0_12, %c0_13, %c0_14] : memref<1x2x1xf32, #tpu.memory_space<vmem>>, vector<1x2x1xf32>
    %25 = vector.shape_cast %24 : vector<1x2x1xf32> to vector<2x1xf32>
    %26 = vector.shape_cast %13 : vector<2x1xf32> to vector<1x2x1xf32>
    tpu.vector_store %arg4[%c0_12, %c0_13, %c0_14], %26 {strides = array<i32>} : memref<1x2x1xf32, #tpu.memory_space<vmem>>, vector<1x2x1xf32>,
    return
  }
  func.func @transform_0(%arg0: i32) -> (i32, i32, i32) {
    %c0_i32 = arith.constant 0 : i32
    %c0_i32_0 = arith.constant 0 : i32
    %c0_i32_1 = arith.constant 0 : i32
    return %arg0, %c0_i32, %c0_i32_0 : i32, i32, i32
  }
  func.func @transform_1(%arg0: i32) -> (i32, i32, i32) {
    %c0_i32 = arith.constant 0 : i32
    %c0_i32_0 = arith.constant 0 : i32
    %c0_i32_1 = arith.constant 0 : i32
    return %arg0, %c0_i32, %c0_i32_0 : i32, i32, i32
  }
  func.func @transform_2(%arg0: i32) -> (i32, i32, i32) {
    %c0_i32 = arith.constant 0 : i32
    %c0_i32_0 = arith.constant 0 : i32
    %c0_i32_1 = arith.constant 0 : i32
    return %arg0, %c0_i32, %c0_i32_0 : i32, i32, i32
  }
  func.func @transform_3(%arg0: i32) -> (i32, i32, i32) {
    %c0_i32 = arith.constant 0 : i32
    %c0_i32_0 = arith.constant 0 : i32
    %c0_i32_1 = arith.constant 0 : i32
    return %arg0, %c0_i32, %c0_i32_0 : i32, i32, i32
  }
}

module attributes {stable_mosaic.version = 11 : i64} {
  func.func @gru_cell_kernel(%arg0: i32, %arg1: i32, %arg2: memref<1x32x256xf32, #tpu.memory_space<vmem>>, %arg3: memref<1x32x256xf32, #tpu.memory_space<vmem>>, %arg4: memref<64x32xf32, #tpu.memory_space<vmem>>, %arg5: memref<64x32xf32, #tpu.memory_space<vmem>>, %arg6: memref<32x32xf32, #tpu.memory_space<vmem>>, %arg7: memref<32x32xf32, #tpu.memory_space<vmem>>, %arg8: memref<64x1xf32, #tpu.memory_space<vmem>>, %arg9: memref<32x1xf32, #tpu.memory_space<vmem>>, %arg10: memref<1x32x256xf32, #tpu.memory_space<vmem>>, %arg11: memref<1x32x256xf32, #tpu.memory_space<vmem>>) attributes {dimension_semantics = [#tpu.dimension_semantics<parallel>, #tpu.dimension_semantics<parallel>], iteration_bounds = array<i64: 2, 1>, scalar_prefetch = 0 : i64, scratch_operands = 0 : i64, tpu.core_type = #tpu.core_type<tc>, window_params = [{transform_indices = @transform_0, window_bounds = array<i64: 1, 32, 256>}, {transform_indices = @transform_1, window_bounds = array<i64: 1, 32, 256>}, {pipeline_mode = #tpu.pipeline_mode<synchronous>, transform_indices = @transform_2, window_bounds = array<i64: 64, 32>}, {pipeline_mode = #tpu.pipeline_mode<synchronous>, transform_indices = @transform_3, window_bounds = array<i64: 64, 32>}, {pipeline_mode = #tpu.pipeline_mode<synchronous>, transform_indices = @transform_4, window_bounds = array<i64: 32, 32>}, {pipeline_mode = #tpu.pipeline_mode<synchronous>, transform_indices = @transform_5, window_bounds = array<i64: 32, 32>}, {pipeline_mode = #tpu.pipeline_mode<synchronous>, transform_indices = @transform_6, window_bounds = array<i64: 64, 1>}, {pipeline_mode = #tpu.pipeline_mode<synchronous>, transform_indices = @transform_7, window_bounds = array<i64: 32, 1>}, {transform_indices = @transform_8, window_bounds = array<i64: 1, 32, 256>}, {transform_indices = @transform_9, window_bounds = array<i64: 1, 32, 256>}]} {
    %c0 = arith.constant 0 : index
    %c0_0 = arith.constant 0 : index
    %c0_1 = arith.constant 0 : index
    %0 = vector.load %arg2[%c0, %c0_0, %c0_1] : memref<1x32x256xf32, #tpu.memory_space<vmem>>, vector<1x32x256xf32>
    %1 = vector.shape_cast %0 : vector<1x32x256xf32> to vector<32x256xf32>
    %c0_2 = arith.constant 0 : index
    %c0_3 = arith.constant 0 : index
    %c0_4 = arith.constant 0 : index
    %2 = vector.load %arg3[%c0_2, %c0_3, %c0_4] : memref<1x32x256xf32, #tpu.memory_space<vmem>>, vector<1x32x256xf32>
    %3 = vector.shape_cast %2 : vector<1x32x256xf32> to vector<32x256xf32>
    %c0_5 = arith.constant 0 : index
    %c0_6 = arith.constant 0 : index
    %4 = vector.load %arg4[%c0_5, %c0_6] : memref<64x32xf32, #tpu.memory_space<vmem>>, vector<64x32xf32>
    %cst = arith.constant dense<0.000000e+00> : vector<64x256xf32>
    %5 = tpu.matmul %4, %1, %cst {dimension_numbers = #tpu.dot_dimension_numbers<[1], [0], [0], [1], [0, 0, 1, 1], [], []>, precision = #tpu.contract_precision<fp32>} : vector<64x32xf32>, vector<32x256xf32>, vector<64x256xf32> -> vector<64x256xf32>
    %c0_7 = arith.constant 0 : index
    %c0_8 = arith.constant 0 : index
    %6 = vector.load %arg5[%c0_7, %c0_8] : memref<64x32xf32, #tpu.memory_space<vmem>>, vector<64x32xf32>
    %cst_9 = arith.constant dense<0.000000e+00> : vector<64x256xf32>
    %7 = tpu.matmul %6, %3, %cst_9 {dimension_numbers = #tpu.dot_dimension_numbers<[1], [0], [0], [1], [0, 0, 1, 1], [], []>, precision = #tpu.contract_precision<fp32>} : vector<64x32xf32>, vector<32x256xf32>, vector<64x256xf32> -> vector<64x256xf32>
    %8 = arith.addf %5, %7 : vector<64x256xf32>
    %c0_10 = arith.constant 0 : index
    %c0_11 = arith.constant 0 : index
    %9 = vector.load %arg8[%c0_10, %c0_11] : memref<64x1xf32, #tpu.memory_space<vmem>>, vector<64x1xf32>
    %10 = vector.broadcast %9 : vector<64x1xf32> to vector<64x256xf32>
    %11 = arith.addf %8, %10 : vector<64x256xf32>
    %12 = vector.extract_strided_slice %11 {offsets = [0, 0], sizes = [32, 256], strides = [1, 1]} : vector<64x256xf32> to vector<32x256xf32>
    %13 = arith.negf %12 : vector<32x256xf32>
    %14 = math.exp %13 : vector<32x256xf32>
    %cst_12 = arith.constant 1.000000e+00 : f32
    %15 = vector.broadcast %cst_12 : f32 to vector<32x256xf32>
    %16 = arith.addf %15, %14 : vector<32x256xf32>
    %17 = arith.divf %15, %16 : vector<32x256xf32>
    %18 = vector.extract_strided_slice %11 {offsets = [32, 0], sizes = [32, 256], strides = [1, 1]} : vector<64x256xf32> to vector<32x256xf32>
    %19 = arith.negf %18 : vector<32x256xf32>
    %20 = math.exp %19 : vector<32x256xf32>
    %cst_13 = arith.constant 1.000000e+00 : f32
    %21 = vector.broadcast %cst_13 : f32 to vector<32x256xf32>
    %22 = arith.addf %21, %20 : vector<32x256xf32>
    %23 = arith.divf %21, %22 : vector<32x256xf32>
    %24 = arith.mulf %3, %23 : vector<32x256xf32>
    %c0_14 = arith.constant 0 : index
    %c0_15 = arith.constant 0 : index
    %25 = vector.load %arg6[%c0_14, %c0_15] : memref<32x32xf32, #tpu.memory_space<vmem>>, vector<32x32xf32>
    %cst_16 = arith.constant dense<0.000000e+00> : vector<32x256xf32>
    %26 = tpu.matmul %25, %1, %cst_16 {dimension_numbers = #tpu.dot_dimension_numbers<[1], [0], [0], [1], [0, 0, 1, 1], [], []>, precision = #tpu.contract_precision<fp32>} : vector<32x32xf32>, vector<32x256xf32>, vector<32x256xf32> -> vector<32x256xf32>
    %c0_17 = arith.constant 0 : index
    %c0_18 = arith.constant 0 : index
    %27 = vector.load %arg7[%c0_17, %c0_18] : memref<32x32xf32, #tpu.memory_space<vmem>>, vector<32x32xf32>
    %cst_19 = arith.constant dense<0.000000e+00> : vector<32x256xf32>
    %28 = tpu.matmul %27, %24, %cst_19 {dimension_numbers = #tpu.dot_dimension_numbers<[1], [0], [0], [1], [0, 0, 1, 1], [], []>, precision = #tpu.contract_precision<fp32>} : vector<32x32xf32>, vector<32x256xf32>, vector<32x256xf32> -> vector<32x256xf32>
    %29 = arith.addf %26, %28 : vector<32x256xf32>
    %c0_20 = arith.constant 0 : index
    %c0_21 = arith.constant 0 : index
    %30 = vector.load %arg9[%c0_20, %c0_21] : memref<32x1xf32, #tpu.memory_space<vmem>>, vector<32x1xf32>
    %31 = vector.broadcast %30 : vector<32x1xf32> to vector<32x256xf32>
    %32 = arith.addf %29, %31 : vector<32x256xf32>
    %33 = math.tanh %32 : vector<32x256xf32>
    %cst_22 = arith.constant 1.000000e+00 : f32
    %34 = vector.broadcast %cst_22 : f32 to vector<32x256xf32>
    %35 = arith.subf %34, %17 : vector<32x256xf32>
    %36 = arith.mulf %3, %35 : vector<32x256xf32>
    %37 = arith.mulf %33, %17 : vector<32x256xf32>
    %38 = arith.addf %36, %37 : vector<32x256xf32>
    %c0_23 = arith.constant 0 : index
    %c0_24 = arith.constant 0 : index
    %c0_25 = arith.constant 0 : index
    %39 = vector.load %arg10[%c0_23, %c0_24, %c0_25] : memref<1x32x256xf32, #tpu.memory_space<vmem>>, vector<1x32x256xf32>
    %40 = vector.shape_cast %39 : vector<1x32x256xf32> to vector<32x256xf32>
    %41 = vector.shape_cast %38 : vector<32x256xf32> to vector<1x32x256xf32>
    tpu.vector_store %arg10[%c0_23, %c0_24, %c0_25], %41 {strides = array<i32>} : memref<1x32x256xf32, #tpu.memory_space<vmem>>, vector<1x32x256xf32>,
    %cst_26 = arith.constant 0.000000e+00 : f32
    %42 = vector.broadcast %cst_26 : f32 to vector<32x256xf32>
    %43 = arith.maximumf %38, %42 : vector<32x256xf32>
    %c0_27 = arith.constant 0 : index
    %c0_28 = arith.constant 0 : index
    %c0_29 = arith.constant 0 : index
    %44 = vector.load %arg11[%c0_27, %c0_28, %c0_29] : memref<1x32x256xf32, #tpu.memory_space<vmem>>, vector<1x32x256xf32>
    %45 = vector.shape_cast %44 : vector<1x32x256xf32> to vector<32x256xf32>
    %46 = vector.shape_cast %43 : vector<32x256xf32> to vector<1x32x256xf32>
    tpu.vector_store %arg11[%c0_27, %c0_28, %c0_29], %46 {strides = array<i32>} : memref<1x32x256xf32, #tpu.memory_space<vmem>>, vector<1x32x256xf32>,
    return
  }
  func.func @transform_0(%arg0: i32, %arg1: i32) -> (i32, i32, i32) {
    %c0_i32 = arith.constant 0 : i32
    %c0_i32_0 = arith.constant 0 : i32
    return %arg0, %c0_i32, %arg1 : i32, i32, i32
  }
  func.func @transform_1(%arg0: i32, %arg1: i32) -> (i32, i32, i32) {
    %c0_i32 = arith.constant 0 : i32
    %c0_i32_0 = arith.constant 0 : i32
    return %arg0, %c0_i32, %arg1 : i32, i32, i32
  }
  func.func @transform_2(%arg0: i32, %arg1: i32) -> (i32, i32) {
    %c0_i32 = arith.constant 0 : i32
    %c0_i32_0 = arith.constant 0 : i32
    %c0_i32_1 = arith.constant 0 : i32
    return %c0_i32, %c0_i32_0 : i32, i32
  }
  func.func @transform_3(%arg0: i32, %arg1: i32) -> (i32, i32) {
    %c0_i32 = arith.constant 0 : i32
    %c0_i32_0 = arith.constant 0 : i32
    %c0_i32_1 = arith.constant 0 : i32
    return %c0_i32, %c0_i32_0 : i32, i32
  }
  func.func @transform_4(%arg0: i32, %arg1: i32) -> (i32, i32) {
    %c0_i32 = arith.constant 0 : i32
    %c0_i32_0 = arith.constant 0 : i32
    %c0_i32_1 = arith.constant 0 : i32
    return %c0_i32, %c0_i32_0 : i32, i32
  }
  func.func @transform_5(%arg0: i32, %arg1: i32) -> (i32, i32) {
    %c0_i32 = arith.constant 0 : i32
    %c0_i32_0 = arith.constant 0 : i32
    %c0_i32_1 = arith.constant 0 : i32
    return %c0_i32, %c0_i32_0 : i32, i32
  }
  func.func @transform_6(%arg0: i32, %arg1: i32) -> (i32, i32) {
    %c0_i32 = arith.constant 0 : i32
    %c0_i32_0 = arith.constant 0 : i32
    %c0_i32_1 = arith.constant 0 : i32
    return %c0_i32, %c0_i32_0 : i32, i32
  }
  func.func @transform_7(%arg0: i32, %arg1: i32) -> (i32, i32) {
    %c0_i32 = arith.constant 0 : i32
    %c0_i32_0 = arith.constant 0 : i32
    %c0_i32_1 = arith.constant 0 : i32
    return %c0_i32, %c0_i32_0 : i32, i32
  }
  func.func @transform_8(%arg0: i32, %arg1: i32) -> (i32, i32, i32) {
    %c0_i32 = arith.constant 0 : i32
    %c0_i32_0 = arith.constant 0 : i32
    return %arg0, %c0_i32, %arg1 : i32, i32, i32
  }
  func.func @transform_9(%arg0: i32, %arg1: i32) -> (i32, i32, i32) {
    %c0_i32 = arith.constant 0 : i32
    %c0_i32_0 = arith.constant 0 : i32
    return %arg0, %c0_i32, %arg1 : i32, i32, i32
  }
}

module attributes {stable_mosaic.version = 11 : i64} {
  func.func @unnorm_kernel(%arg0: i32, %arg1: memref<1x2x512xf32, #tpu.memory_space<vmem>>, %arg2: memref<1x2x1xf32, #tpu.memory_space<vmem>>, %arg3: memref<1x2x1xf32, #tpu.memory_space<vmem>>, %arg4: memref<1x2x512xf32, #tpu.memory_space<vmem>>) attributes {dimension_semantics = [#tpu.dimension_semantics<parallel>], iteration_bounds = array<i64: 2>, scalar_prefetch = 0 : i64, scratch_operands = 0 : i64, tpu.core_type = #tpu.core_type<tc>, window_params = [{transform_indices = @transform_0, window_bounds = array<i64: 1, 2, 512>}, {transform_indices = @transform_1, window_bounds = array<i64: 1, 2, 1>}, {transform_indices = @transform_2, window_bounds = array<i64: 1, 2, 1>}, {transform_indices = @transform_3, window_bounds = array<i64: 1, 2, 512>}]} {
    %c0 = arith.constant 0 : index
    %c0_0 = arith.constant 0 : index
    %c0_1 = arith.constant 0 : index
    %0 = vector.load %arg1[%c0, %c0_0, %c0_1] : memref<1x2x512xf32, #tpu.memory_space<vmem>>, vector<1x2x512xf32>
    %1 = vector.shape_cast %0 : vector<1x2x512xf32> to vector<2x512xf32>
    %c0_2 = arith.constant 0 : index
    %c0_3 = arith.constant 0 : index
    %c0_4 = arith.constant 0 : index
    %2 = vector.load %arg3[%c0_2, %c0_3, %c0_4] : memref<1x2x1xf32, #tpu.memory_space<vmem>>, vector<1x2x1xf32>
    %3 = vector.shape_cast %2 : vector<1x2x1xf32> to vector<2x1xf32>
    %4 = vector.broadcast %3 : vector<2x1xf32> to vector<2x512xf32>
    %5 = arith.mulf %1, %4 : vector<2x512xf32>
    %c0_5 = arith.constant 0 : index
    %c0_6 = arith.constant 0 : index
    %c0_7 = arith.constant 0 : index
    %6 = vector.load %arg2[%c0_5, %c0_6, %c0_7] : memref<1x2x1xf32, #tpu.memory_space<vmem>>, vector<1x2x1xf32>
    %7 = vector.shape_cast %6 : vector<1x2x1xf32> to vector<2x1xf32>
    %8 = vector.broadcast %7 : vector<2x1xf32> to vector<2x512xf32>
    %9 = arith.addf %5, %8 : vector<2x512xf32>
    %c0_8 = arith.constant 0 : index
    %c0_9 = arith.constant 0 : index
    %c0_10 = arith.constant 0 : index
    %10 = vector.load %arg4[%c0_8, %c0_9, %c0_10] : memref<1x2x512xf32, #tpu.memory_space<vmem>>, vector<1x2x512xf32>
    %11 = vector.shape_cast %10 : vector<1x2x512xf32> to vector<2x512xf32>
    %12 = vector.shape_cast %9 : vector<2x512xf32> to vector<1x2x512xf32>
    tpu.vector_store %arg4[%c0_8, %c0_9, %c0_10], %12 {strides = array<i32>} : memref<1x2x512xf32, #tpu.memory_space<vmem>>, vector<1x2x512xf32>,
    return
  }
  func.func @transform_0(%arg0: i32) -> (i32, i32, i32) {
    %c0_i32 = arith.constant 0 : i32
    %c0_i32_0 = arith.constant 0 : i32
    %c0_i32_1 = arith.constant 0 : i32
    return %arg0, %c0_i32, %c0_i32_0 : i32, i32, i32
  }
  func.func @transform_1(%arg0: i32) -> (i32, i32, i32) {
    %c0_i32 = arith.constant 0 : i32
    %c0_i32_0 = arith.constant 0 : i32
    %c0_i32_1 = arith.constant 0 : i32
    return %arg0, %c0_i32, %c0_i32_0 : i32, i32, i32
  }
  func.func @transform_2(%arg0: i32) -> (i32, i32, i32) {
    %c0_i32 = arith.constant 0 : i32
    %c0_i32_0 = arith.constant 0 : i32
    %c0_i32_1 = arith.constant 0 : i32
    return %arg0, %c0_i32, %c0_i32_0 : i32, i32, i32
  }
  func.func @transform_3(%arg0: i32) -> (i32, i32, i32) {
    %c0_i32 = arith.constant 0 : i32
    %c0_i32_0 = arith.constant 0 : i32
    %c0_i32_1 = arith.constant 0 : i32
    return %arg0, %c0_i32, %c0_i32_0 : i32, i32, i32
  }
}

</mosaic_0001>

<bundles_post_ra>
// kernel: norm_conv2d_gru_forward.4
= control target key start
LH: loop header
LB: loop body
LE: loop exit
PB: predicated region body
PF: predicated region fallthrough
CT: control target
= control target key end

     0   :  { %s470_s12 = smov 0   ;;  %s511_s0 = inlined_call_operand.vmem [shape: f32[2,2,512], index: 0, kind: input, shape index: {}]   ;;  %s512_s1 = inlined_call_operand.vmem [shape: f32[2,2,512], index: 1, kind: output, shape index: {0}]   ;;  %s513_s2 = inlined_call_operand.vmem [shape: f32[2,2,1], index: 2, kind: output, shape index: {1}]   ;;  %s514_s3 = inlined_call_operand.vmem [shape: f32[2,2,1], index: 3, kind: output, shape index: {2}]  }
   0x1 LB: > { %s410_s13 = sadd.s32 4294967295, %s446_s12   ;;  %p414_p0 = scmp.ge.s32.totalorder %s446_s12, 1  ;;  %s446_s12 = sphi %s470_s12, %s14_s12  }
   0x2   : > { %p142_p1 = scmp.lt.s32.totalorder %s446_s12, 3 }
   0x4   : > { %p143_p2 = pnand %p414_p0, %p142_p1 }
   0x5   : > { %p174_p3 = scmp.lt.s32.totalorder (!%p143_p2), %s410_s13, 1  ;;  %v198_v0 = vlaneseq (!%p143_p2)  ;;  %v448_v1 = vmov (!%p143_p2), 1983009808   ;;  %vm215_vm0 = vcmask (!%p143_p2), 1041408   ;;  %v449_v19 = vmov (!%p143_p2), 269488144  }
   0x6   : > { %146 = sbr.rel (%p143_p2) target bundleno = 364 (0x16c), region = 24  ;;  %v196_v2 = vunpack.c.l.s4 (!%p143_p2), %v448_v1  ;;  %v229_v20 = vunpack.c.l.s4 (!%p143_p2), %v449_v19  ;;  %vm290_vm1 = vcmask (!%p143_p2), 1024  }
   0x7   : > { %v199_v3 = vshrl.u32 (!%p143_p2), %v198_v0, 7 }
   0x8   : > { %v197_v4 = vunpack.c.0.s8 (!%p143_p2), %v196_v2  ;;  %v230_v21 = vunpack.c.0.s8 (!%p143_p2), %v229_v20 }
   0xa   : > { %v200_v5 = vsub.s32 (!%p143_p2), %v197_v4, %v199_v3  ;;  %v233_v22 = vsub.s32 (!%p143_p2), %v230_v21, %v199_v3 }
   0xd   : > { %s516_s13 = smov (!%p174_p3, %s410_s13), 1 }
   0xe   : > { %s423_s14 = sshll.u32 %s516_s13, 3  ;;  %s419_s18 = sshll.u32 %s516_s13, 1 }
   0xf   : > { %s178_s17 = scalar_lea.vmem %s511_s0, %s423_s14  ;;  %s187_s21 = scalar_lea.vmem %s513_s2, %s419_s18 }
  0x10   : > { %v192_v6 = vld [vmem:[%s178_s17] sm:$0xff]  ;;  %s191_s24 = scalar_lea.vmem %s514_s3, %s419_s18  ;;  %s183_s27 = scalar_lea.vmem %s512_s1, %s423_s14 }
  0x11   : > { %v194_v7 = vcombine.high %v192_v6, %v192_v6  ;;  %v201_v8 = vrot.slane %v192_v6, %v200_v5 }
  0x13   : > { %v208_v9 = vrot.slane %v194_v7, %v200_v5  ;;  %v209_v10 = vcombine.high %v201_v8, %v201_v8  ;;  %v216_v11 = vsel %vm215_vm0, %v201_v8, 0.0 }
  0x15   : > { %v210_v12 = vcombine.high %v208_v9, %v208_v9  ;;  %v217_v13 = vsel %vm215_vm0, %v209_v10, 0.0  ;;  %v219_v14 = vsel %vm215_vm0, %v208_v9, 0.0 }
  0x16   : > { %v218_v15 = vadd.f32 %v217_v13, %v216_v11 }
  0x17   : > { %v221_v16 = vsel %vm215_vm0, %v210_v12, 0.0 }
  0x18   : > { %v220_v17 = vadd.f32 %v219_v14, %v218_v15 }
  0x1a   : > { %v222_v18 = vadd.f32 %v221_v16, %v220_v17 }
  0x1c   : > { %223 = vadd.xlane.f32.xlu0 %v222_v18 }
  0xa9   : > { %v224_v23 = vpop.xlane.xlu0 %223 }
  0xaa   : > { %v226_v24 = vmul.f32 0.001953125, %v224_v23 }
  0xac   : > { %v234_v25 = vrot.slane %v226_v24, %v233_v22  ;;  %291 = vst.msk [vmem:[%s187_s21] sm:$0x3] %vm290_vm1, %v226_v24 }
  0xae   : > { %v236_v26 = vsub.f32 %v192_v6, %v234_v25 }
  0xb0   : > { %v237_v27 = vmul.f32 %v236_v26, %v236_v26 }
  0xb2   : > { %v239_v28 = vcombine.high %v237_v27, %v237_v27  ;;  %v246_v29 = vrot.slane %v237_v27, %v200_v5 }
  0xb4   : > { %v253_v30 = vrot.slane %v239_v28, %v200_v5  ;;  %v254_v31 = vcombine.high %v246_v29, %v246_v29  ;;  %v260_v33 = vsel %vm215_vm0, %v246_v29, 0.0 }
  0xb6   : > { %v255_v32 = vcombine.high %v253_v30, %v253_v30  ;;  %v261_v34 = vsel %vm215_vm0, %v254_v31, 0.0  ;;  %v263_v36 = vsel %vm215_vm0, %v253_v30, 0.0 }
  0xb7   : > { %v262_v35 = vadd.f32 %v261_v34, %v260_v33 }
  0xb8   : > { %v265_v38 = vsel %vm215_vm0, %v255_v32, 0.0 }
  0xb9   : > { %v264_v37 = vadd.f32 %v263_v36, %v262_v35 }
  0xbb   : > { %v266_v39 = vadd.f32 %v265_v38, %v264_v37 }
  0xbd   : > { %267 = vadd.xlane.f32.xlu0 %v266_v39 }
 0x14a   : > { %v268_v40 = vpop.xlane.xlu0 %267 }
 0x14b   : > { %v269_v41 = vmul.f32 0.0019569471, %v268_v40 }
 0x14d   : > { %436 = vrsqrt.f32 %v269_v41  ;;  %vm272_vm2 = vcmp.eq.f32.partialorder %v269_v41, inf  ;;  %v275_v44 = vand.u32 2147483648, %v269_v41  ;;  %vm274_vm3 = vcmp.eq.f32.partialorder %v269_v41, 0.0 }
 0x157   : > { %v437_v42 = vpop.eup %436 }
 0x158   : > { %v271_v43 = vmul.f32 %v437_v42, %v269_v41 }
 0x15a   : > { %v273_v45 = vsel %vm272_vm2, %v269_v41, %v271_v43 }
 0x15b   : > { %v276_v46 = vsel %vm274_vm3, %v275_v44, %v273_v45 }
 0x15c   : > { %438 = vrcp.f32 %v276_v46  ;;  %292 = vst.msk [vmem:[%s191_s24] sm:$0x3] %vm290_vm1, %v276_v46 }
 0x166   : > { %v439_v47 = vpop.eup %438 }
 0x167   : > { %v286_v48 = vrot.slane %v439_v47, %v233_v22 }
 0x169   : > { %v288_v49 = vmul.f32 %v286_v48, %v236_v26 }
 0x16b   : > { %289 = vst [vmem:[%s183_s27] sm:$0xff] %v288_v49 }
 0x16c PF: > { %s14_s12 = sadd.s32 1, %s446_s12  }
 0x16d   : > { %p11_p4 = scmp.ge.s32.totalorder %s14_s12, 4  }
 0x16f   :  { %13 = sbr.rel (!%p11_p4) target bundleno = 1 (0x1), region = 78 }

// kernel: norm_conv2d_gru_forward.5
= control target key start
LH: loop header
LB: loop body
LE: loop exit
PB: predicated region body
PF: predicated region fallthrough
CT: control target
= control target key end

     0   :  { %s4799_s30 = smov 0   ;;  %s4801_s10 = smov 0   ;;  %s5839_s0 = inlined_call_operand.vmem [shape: f32[2,32,256], index: 0, kind: input, shape index: {}]   ;;  %s5840_s1 = inlined_call_operand.vmem [shape: f32[2,32,256], index: 1, kind: input, shape index: {}]   ;;  %s5841_s2 = inlined_call_operand.vmem [shape: f32[64,32], index: 2, kind: input, shape index: {}]   ;;  %s5842_s3 = inlined_call_operand.vmem [shape: f32[64,32], index: 3, kind: input, shape index: {}]   ;;  %s5843_s4 = inlined_call_operand.vmem [shape: f32[32,32], index: 4, kind: input, shape index: {}]   ;;  %s5844_s5 = inlined_call_operand.vmem [shape: f32[32,32], index: 5, kind: input, shape index: {}]   ;;  %s5845_s6 = inlined_call_operand.vmem [shape: f32[64,1], index: 6, kind: input, shape index: {}]   ;;  %s5846_s7 = inlined_call_operand.vmem [shape: f32[32,1], index: 7, kind: input, shape index: {}]   ;;  %s5847_s8 = inlined_call_operand.vmem [shape: f32[2,32,256], index: 8, kind: output, shape index: {0}]   ;;  %s5848_s9 = inlined_call_operand.vmem [shape: f32[2,32,256], index: 9, kind: output, shape index: {1}]  }
   0x1   :  { %s4803_s11 = smov 0  }
   0x2 LB: > { %s32_s12 = sadd.s32 1, %s4741_s10  ;;  %p4120_p0 = scmp.ge.s32.totalorder %s4745_s11, 1  ;;  %s4745_s11 = sphi %s4803_s11, %s20_s11   ;;  %s4741_s10 = sphi %s4801_s10, %s5892_s10   ;;  %s4737_s30 = sphi %s4799_s30, %s5891_s30  }
   0x3   : > { %p34_p1 = scmp.ge.s32.totalorder %s32_s12, 2  ;;  %p330_p2 = scmp.lt.s32.totalorder %s4745_s11, 3 }
   0x5   : > { %s5894_s12 = smov (%p34_p1, %s32_s12), 0  ;;  %p331_p3 = pnand %p4120_p0, %p330_p2 }
   0x7   : > { %334 = sbr.rel (%p331_p3) target bundleno = 992 (0x3e0), region = 52 }
   0xe   : > { %p393_p4 = scmp.lt.s32.totalorder %s4737_s30, 1  ;;  %v456_v0 = vld [vmem:[%s5842_s3] sm:$0xff]  ;;  %vm464_vm0 = vcmask 261120   ;;  %v5850_v1 = vmov 0.0   ;;  %v457_v2 = vld [vmem:[%s5842_s3 + $0x8] sm:$0xff]  ;;  %v458_v25 = vld [vmem:[%s5842_s3 + $0x10] sm:$0xff] }
   0xf   : > { %1028 = vmatprep.mubr.f32.mxu0 %v5850_v1  ;;  %561 = vmatprep.mubr.f32.mxu1 %v5850_v1  ;;  %v466_v3 = vsel %vm464_vm0, %v456_v0, 0  ;;  %v469_v4 = vsel %vm464_vm0, %v457_v2, 0  ;;  %v472_v34 = vsel %vm464_vm0, %v458_v25, 0  ;;  %v459_v41 = vld [vmem:[%s5842_s3 + $0x18] sm:$0xff]  ;;  %v460_v53 = vld [vmem:[%s5842_s3 + $0x20] sm:$0xff]  ;;  %v461_v60 = vld [vmem:[%s5842_s3 + $0x28] sm:$0xff] }
  0x10   : > { %s5896_s30 = smov (!%p393_p4, %s4737_s30), 1  ;;  %v4838_v8 = vand.u32 4294901760, %v466_v3  ;;  %v4845_v20 = vand.u32 4294901760, %v469_v4  ;;  %v4896_v47 = vand.u32 4294901760, %v472_v34  ;;  %v475_v49 = vsel %vm464_vm0, %v459_v41, 0  ;;  %v462_v2 = vld [vmem:[%s5842_s3 + $0x30] sm:$0xff] }
  0x11   : > { %s4826_s17 = sshll.u32 %s5896_s30, 6  ;;  %v4919_v57 = vand.u32 4294901760, %v475_v49  ;;  %v478_v58 = vsel %vm464_vm0, %v460_v53, 0  ;;  %v481_v0 = vsel %vm464_vm0, %v461_v60, 0 }
  0x12   : > { %s4832_s20 = scalar_lea.vmem %s5840_s1, %s4826_s17  ;;  %v4867_v33 = vsub.f32 %v466_v3, %v4838_v8  ;;  %v4894_v46 = vsub.f32 %v469_v4, %v4845_v20  ;;  %v4917_v56 = vsub.f32 %v472_v34, %v4896_v47  ;;  %v4934_v63 = vand.u32 4294901760, %v478_v58  ;;  %s4978_s18 = scalar_lea.vmem %s5839_s0, %s4826_s17 }
  0x13   : > { %v441_v5 = vld [vmem:[%s4832_s20 + $0x8] sm:$0xff]  ;;  %v443_v6 = vld [vmem:[%s4832_s20 + $0x18] sm:$0xff]  ;;  %v440_v7 = vld [vmem:[%s4832_s20] sm:$0xff]  ;;  %v4932_v62 = vsub.f32 %v475_v49, %v4919_v57  ;;  %s5799_s29 = scalar_lea.vmem %s5847_s8, %s4826_s17  ;;  %s5806_s14 = scalar_lea.vmem %s5848_s9, %s4826_s17 }
  0x14   : > { %v489_v9 = vand.u32 4294901760, %v441_v5  ;;  %v493_v10 = vand.u32 4294901760, %v443_v6  ;;  %v442_v11 = vld [vmem:[%s4832_s20 + $0x10] sm:$0xff]  ;;  %v491_v12 = vand.u32 4294901760, %v440_v7  ;;  %v445_v13 = vld [vmem:[%s4832_s20 + $0x28] sm:$0xff]  ;;  %v447_v14 = vld [vmem:[%s4832_s20 + $0x38] sm:$0xff]  ;;  %v4943_v4 = vsub.f32 %v478_v58, %v4934_v63 }
  0x15   : > { %v495_v15 = vand.u32 4294901760, %v442_v11  ;;  %v497_v16 = vand.u32 4294901760, %v445_v13  ;;  %v501_v17 = vand.u32 4294901760, %v447_v14  ;;  %v444_v18 = vld [vmem:[%s4832_s20 + $0x20] sm:$0xff]  ;;  %v446_v19 = vld [vmem:[%s4832_s20 + $0x30] sm:$0xff]  ;;  %v564_v45 = vand.u32 4294901760, %v4867_v33 }
  0x16   : > { %v4151_v21 = vpack.c.bf16 %v493_v10, %v489_v9  ;;  %v4847_v22 = vsub.f32 %v441_v5, %v489_v9  ;;  %v4849_v23 = vsub.f32 %v443_v6, %v493_v10  ;;  %v4851_v24 = vsub.f32 %v440_v7, %v491_v12  ;;  %v463_v7 = vld [vmem:[%s5842_s3 + $0x38] sm:$0xff]  ;;  %v4987_v34 = vld [vmem:[%s4978_s18 + $0x8] sm:$0xff] }
  0x17   : > { %v4856_v26 = vpack.c.bf16 %v495_v15, %v491_v12  ;;  %v4858_v27 = vsub.f32 %v442_v11, %v495_v15  ;;  %v4860_v28 = vpack.c.bf16 %v501_v17, %v497_v16  ;;  %v4862_v29 = vsub.f32 %v445_v13, %v497_v16  ;;  %v4990_v41 = vld [vmem:[%s4978_s18 + $0x18] sm:$0xff] }
  0x18   : > { %4176 = vmatprep.subr.bf16.mxu0 %v4151_v21  ;;  %v4864_v30 = vsub.f32 %v447_v14, %v501_v17  ;;  %v499_v31 = vand.u32 4294901760, %v444_v18  ;;  %v503_v32 = vand.u32 4294901760, %v446_v19  ;;  %4152 = vmatprep.subr.bf16.mxu1 %v4151_v21  ;;  %v652_v35 = vand.u32 4294901760, %v4847_v22 }
  0x19   : > { %4178 = vmatpush1.bf16.msra.mxu0 %v4856_v26  ;;  %v664_v36 = vand.u32 4294901760, %v4849_v23  ;;  %v658_v37 = vand.u32 4294901760, %v4851_v24  ;;  %4154 = vmatpush1.bf16.msra.mxu1 %v4856_v26  ;;  %v670_v42 = vand.u32 4294901760, %v4858_v27  ;;  %v676_v44 = vand.u32 4294901760, %v4862_v29 }
  0x1a   : > { %4180 = vmatprep.subr.bf16.mxu0 %v4860_v28  ;;  %v4876_v38 = vpack.c.bf16 %v503_v32, %v499_v31  ;;  %v4878_v39 = vsub.f32 %v444_v18, %v499_v31  ;;  %v4880_v40 = vsub.f32 %v446_v19, %v503_v32  ;;  %4156 = vmatprep.subr.bf16.mxu1 %v4860_v28  ;;  %v688_v48 = vand.u32 4294901760, %v4864_v30 }
  0x1b   : > { %v4183_v43 = vpack.c.bf16 %v664_v36, %v652_v35  ;;  %v4185_v50 = vpack.c.bf16 %v670_v42, %v658_v37  ;;  %v575_v55 = vand.u32 4294901760, %v4894_v46  ;;  %v586_v61 = vand.u32 4294901760, %v4917_v56 }
  0x1c   : > { %v682_v51 = vand.u32 4294901760, %v4878_v39  ;;  %v694_v52 = vand.u32 4294901760, %v4880_v40  ;;  %v4187_v54 = vpack.c.bf16 %v688_v48, %v676_v44  ;;  %v597_v3 = vand.u32 4294901760, %v4932_v62 }
  0x1d   : > { %4182 = vmatpush1.bf16.msra.mxu0 %v4876_v38  ;;  %4158 = vmatpush1.bf16.msra.mxu1 %v4876_v38  ;;  %v4945_v5 = vand.u32 4294901760, %v481_v0  ;;  %v484_v6 = vsel %vm464_vm0, %v462_v2, 0  ;;  %v608_v9 = vand.u32 4294901760, %v4943_v4  ;;  %v487_v12 = vsel %vm464_vm0, %v463_v7, 0 }
  0x1e   : > { %4184 = vmatprep.subr.bf16.mxu0 %v4183_v43  ;;  %v4189_v59 = vpack.c.bf16 %v694_v52, %v682_v51  ;;  %v4956_v11 = vand.u32 4294901760, %v484_v6  ;;  %v4964_v15 = vand.u32 4294901760, %v487_v12  ;;  %v565_v16 = vsub.f32 %v4867_v33, %v564_v45 }
  0x1f   : > { %v4954_v10 = vsub.f32 %v481_v0, %v4945_v5  ;;  %v587_v25 = vsub.f32 %v4917_v56, %v586_v61  ;;  %v653_v43 = vsub.f32 %v4847_v22, %v652_v35  ;;  %v659_v49 = vsub.f32 %v4851_v24, %v658_v37 }
  0x20   : > { %1032 = vmatmul.mubr.f32.vlgmr.msra.gmra.mrb[0].mxu0 %v564_v45  ;;  %v4962_v14 = vsub.f32 %v484_v6, %v4956_v11  ;;  %v4970_v18 = vsub.f32 %v487_v12, %v4964_v15  ;;  %v566_v19 = vand.u32 4294901760, %v565_v16  ;;  %v665_v45 = vsub.f32 %v4849_v23, %v664_v36 }
  0x21   : > { %1037 = vmatprep.mubr.f32.mxu0 %v5850_v1  ;;  %4186 = vmatpush1.bf16.msra.mxu0 %v4185_v50  ;;  %v619_v13 = vand.u32 4294901760, %v4954_v10  ;;  %v671_v50 = vsub.f32 %v4858_v27, %v670_v42  ;;  %v588_v53 = vand.u32 4294901760, %v587_v25  ;;  %v677_v35 = vsub.f32 %v4862_v29, %v676_v44 }
  0x22   : > { %4188 = vmatprep.subr.bf16.mxu0 %v4187_v54  ;;  %v630_v17 = vand.u32 4294901760, %v4962_v14  ;;  %567 = vmatmul.mubr.f32.vlgmr.msra.gmra.mrb[0].mxu1 %v566_v19  ;;  %v641_v31 = vand.u32 4294901760, %v4970_v18  ;;  %v598_v54 = vsub.f32 %v4932_v62, %v597_v3  ;;  %v689_v36 = vsub.f32 %v4864_v30, %v688_v48 }
  0x23   : > { %572 = vmatprep.mubr.f32.mxu1 %v5850_v1  ;;  %v654_v37 = vand.u32 4294901760, %v653_v43  ;;  %v1399_v42 = vand.u32 4294901760, %v4987_v34  ;;  %v1403_v58 = vand.u32 4294901760, %v4990_v41  ;;  %v672_v44 = vand.u32 4294901760, %v671_v50  ;;  %v437_v50 = vld [vmem:[%s4978_s18 + $0x28] sm:$0xff] }
  0x24   : > { %1041 = vmatmul.mubr.f32.gmra.mrb[2].mxu0 %v575_v55  ;;  %v683_v48 = vsub.f32 %v4878_v39, %v682_v51  ;;  %v599_v0 = vand.u32 4294901760, %v598_v54  ;;  %v609_v2 = vsub.f32 %v4943_v4, %v608_v9  ;;  %v690_v6 = vand.u32 4294901760, %v689_v36  ;;  %v436_v36 = vld [vmem:[%s4978_s18 + $0x20] sm:$0xff] }
  0x25   : > { %1046 = vmatprep.mubr.f32.mxu0 %v5850_v1  ;;  %4190 = vmatpush1.bf16.msra.mxu0 %v4189_v59  ;;  %v660_v59 = vand.u32 4294901760, %v659_v49  ;;  %v5029_v51 = vpack.c.bf16 %v1403_v58, %v1399_v42  ;;  %v620_v16 = vsub.f32 %v4954_v10, %v619_v13  ;;  %v5053_v25 = vsub.f32 %v4987_v34, %v1399_v42  ;;  %v434_v49 = vld [vmem:[%s4978_s18 + $0x10] sm:$0xff] }
  0x26   : > { %4192 = vmatprep.subr.bf16.mxu0 %v4151_v21  ;;  %v576_v21 = vsub.f32 %v4894_v46, %v575_v55  ;;  %v666_v55 = vand.u32 4294901760, %v665_v45  ;;  %v684_v7 = vand.u32 4294901760, %v683_v48  ;;  %v4169_v43 = vpack.c.bf16 %v4858_v27, %v4851_v24  ;;  %v432_v45 = vld [vmem:[%s4978_s18] sm:$0xff]  ;;  %v449_v48 = vld [vmem:[%s5841_s2 + $0x8] sm:$0xff] }
  0x27   : > { %v1562_v34 = vand.u32 4294901760, %v5053_v25  ;;  %v1405_v24 = vand.u32 4294901760, %v434_v49  ;;  %v4173_v27 = vpack.c.bf16 %v4880_v40, %v4878_v39  ;;  %v1407_v54 = vand.u32 4294901760, %v437_v50 }
  0x28   : > { %1050 = vmatmul.mubr.f32.gmra.mrb[4].mxu0 %v586_v61  ;;  %v577_v32 = vand.u32 4294901760, %v576_v21  ;;  %v4159_v60 = vpack.c.bf16 %v666_v55, %v654_v37  ;;  %v695_v61 = vsub.f32 %v4880_v40, %v694_v52  ;;  %v4161_v52 = vpack.c.bf16 %v672_v44, %v660_v59  ;;  %v438_v37 = vld [vmem:[%s4978_s18 + $0x30] sm:$0xff] }
  0x29   : > { %1055 = vmatprep.mubr.f32.mxu0 %v5850_v1  ;;  %v631_v21 = vsub.f32 %v4962_v14, %v630_v17  ;;  %v1563_v55 = vsub.f32 %v5053_v25, %v1562_v34  ;;  %v1409_v39 = vand.u32 4294901760, %v436_v36  ;;  %v1413_v40 = vand.u32 4294901760, %v438_v37 }
  0x2a   : > { %578 = vmatmul.mubr.f32.gmra.mrb[2].mxu1 %v577_v32  ;;  %4160 = vmatprep.subr.bf16.mxu1 %v4159_v60  ;;  %v696_v12 = vand.u32 4294901760, %v695_v61  ;;  %v4167_v32 = vpack.c.bf16 %v4849_v23, %v4847_v22  ;;  %v4171_v22 = vpack.c.bf16 %v4864_v30, %v4862_v29  ;;  %v1401_v23 = vand.u32 4294901760, %v432_v45 }
  0x2b   : > { %583 = vmatprep.mubr.f32.mxu1 %v5850_v1  ;;  %4162 = vmatpush1.bf16.msra.mxu1 %v4161_v52  ;;  %v5100_v60 = vpack.c.bf16 %v1413_v40, %v1409_v39 }
  0x2c   : > { %1059 = vmatmul.mubr.f32.gmra.mrb[6].mxu0 %v597_v3  ;;  %v678_v3 = vand.u32 4294901760, %v677_v35  ;;  %v5091_v30 = vpack.c.bf16 %v1405_v24, %v1401_v23 }
  0x2d   : > { %1064 = vmatprep.mubr.f32.mxu0 %v5850_v1 }
  0x2e   : > { %589 = vmatmul.mubr.f32.gmra.mrb[4].mxu1 %v588_v53  ;;  %v4163_v19 = vpack.c.bf16 %v690_v6, %v678_v3  ;;  %v439_v53 = vld [vmem:[%s4978_s18 + $0x38] sm:$0xff]  ;;  %v5134_v3 = vsub.f32 %v434_v49, %v1405_v24  ;;  %v5136_v6 = vsub.f32 %v437_v50, %v1407_v54 }
  0x2f   : > { %594 = vmatprep.mubr.f32.mxu1 %v5850_v1  ;;  %v1411_v35 = vand.u32 4294901760, %v439_v53 }
  0x30   : > { %1068 = vmatmul.mubr.f32.gmra.mrb[8].mxu0 %v608_v9  ;;  %v610_v9 = vand.u32 4294901760, %v609_v2  ;;  %4164 = vmatprep.subr.bf16.mxu1 %v4163_v19  ;;  %v5132_v2 = vsub.f32 %v432_v45, %v1401_v23  ;;  %v1580_v19 = vand.u32 4294901760, %v5134_v3 }
  0x31   : > { %1073 = vmatprep.mubr.f32.mxu0 %v5850_v1  ;;  %v5093_v42 = vpack.c.bf16 %v1411_v35, %v1407_v54  ;;  %v5138_v52 = vsub.f32 %v439_v53, %v1411_v35 }
  0x32   : > { %600 = vmatmul.mubr.f32.gmra.mrb[6].mxu1 %v599_v0  ;;  %v450_v0 = vld [vmem:[%s5841_s2 + $0x10] sm:$0xff]  ;;  %v1581_v45 = vsub.f32 %v5134_v3, %v1580_v19 }
  0x33   : > { %605 = vmatprep.mubr.f32.mxu1 %v5850_v1 }
  0x34   : > { %1077 = vmatmul.mubr.f32.gmra.mrb[10].mxu0 %v619_v13  ;;  %v642_v13 = vsub.f32 %v4970_v18, %v641_v31 }
  0x35   : > { %1082 = vmatprep.mubr.f32.mxu0 %v5850_v1 }
  0x36   : > { %611 = vmatmul.mubr.f32.gmra.mrb[8].mxu1 %v610_v9  ;;  %v451_v9 = vld [vmem:[%s5841_s2 + $0x18] sm:$0xff] }
  0x37   : > { %616 = vmatprep.mubr.f32.mxu1 %v5850_v1 }
  0x38   : > { %1086 = vmatmul.mubr.f32.gmra.mrb[12].mxu0 %v630_v17  ;;  %v643_v17 = vand.u32 4294901760, %v642_v13 }
  0x39   : > { %1091 = vmatprep.mubr.f32.mxu0 %v5850_v1 }
  0x3c   : > { %1095 = vmatmul.mubr.f32.gmra.mrb[14].mxu0 %v641_v31  ;;  %v5056_v31 = vsub.f32 %v4990_v41, %v1403_v58  ;;  %v1564_v58 = vand.u32 4294901760, %v1563_v55 }
  0x3d   : > { %1189 = vmatprep.mubr.f32.mxu0 %v5850_v1 }
  0x3e   : > { %v1574_v41 = vand.u32 4294901760, %v5056_v31 }
  0x40   : > { %1191 = vmatmul.mubr.f32.vlgmr.msra.gmra.mrb[0].mxu0 %v4838_v8  ;;  %v1575_v29 = vsub.f32 %v5056_v31, %v1574_v41 }
  0x41   : > { %1196 = vmatprep.mubr.f32.mxu0 %v5850_v1  ;;  %4194 = vmatpush1.bf16.msra.mxu0 %v4856_v26  ;;  %v4165_v26 = vpack.c.bf16 %v696_v12, %v684_v7  ;;  %v1382_v12 = vsel %vm464_vm0, %v450_v0, 0 }
  0x42   : > { %4196 = vmatprep.subr.bf16.mxu0 %v4860_v28  ;;  %v621_v28 = vand.u32 4294901760, %v620_v16  ;;  %v1576_v59 = vand.u32 4294901760, %v1575_v29  ;;  %v1568_v16 = vand.u32 4294901760, %v5132_v2 }
  0x43   : > { %4166 = vmatpush1.bf16.msra.mxu1 %v4165_v26  ;;  %v5157_v26 = vsub.f32 %v438_v37, %v1413_v40 }
  0x44   : > { %1198 = vmatmul.mubr.f32.gmra.mrb[2].mxu0 %v4845_v20  ;;  %622 = vmatmul.mubr.f32.gmra.mrb[10].mxu1 %v621_v28  ;;  %v5103_v44 = vpack.c.bf16 %v1576_v59, %v1564_v58  ;;  %v1586_v28 = vand.u32 4294901760, %v5136_v6 }
  0x45   : > { %1203 = vmatprep.mubr.f32.mxu0 %v5850_v1  ;;  %4198 = vmatpush1.bf16.msra.mxu0 %v4876_v38  ;;  %v632_v38 = vand.u32 4294901760, %v631_v21  ;;  %v1598_v21 = vand.u32 4294901760, %v5138_v52  ;;  %v1604_v50 = vand.u32 4294901760, %v5157_v26 }
  0x46   : > { %4200 = vmatprep.subr.bf16.mxu0 %v5029_v51  ;;  %627 = vmatprep.mubr.f32.mxu1 %v5850_v1  ;;  %v1587_v53 = vsub.f32 %v5136_v6, %v1586_v28 }
  0x47   : > { %4168 = vmatprep.subr.bf16.mxu1 %v4167_v32  ;;  %v1385_v32 = vsel %vm464_vm0, %v451_v9, 0  ;;  %v1605_v55 = vsub.f32 %v5157_v26, %v1604_v50 }
  0x48   : > { %1205 = vmatmul.mubr.f32.gmra.mrb[4].mxu0 %v4896_v47  ;;  %633 = vmatmul.mubr.f32.gmra.mrb[12].mxu1 %v632_v38  ;;  %v5189_v23 = vand.u32 4294901760, %v1385_v32  ;;  %v1588_v29 = vand.u32 4294901760, %v1587_v53 }
  0x49   : > { %1210 = vmatprep.mubr.f32.mxu0 %v5850_v1  ;;  %638 = vmatprep.mubr.f32.mxu1 %v5850_v1 }
  0x4c   : > { %1212 = vmatmul.mubr.f32.gmra.mrb[6].mxu0 %v4919_v57  ;;  %644 = vmatmul.mubr.f32.gmra.mrb[14].mxu1 %v643_v17  ;;  %v5167_v17 = vand.u32 4294901760, %v1382_v12 }
  0x4d   : > { %1217 = vmatprep.mubr.f32.mxu0 %v5850_v1  ;;  %754 = vmatprep.mubr.f32.mxu1 %v5850_v1 }
  0x4e   : > { %v5198_v54 = vsub.f32 %v1382_v12, %v5167_v17 }
  0x50   : > { %1219 = vmatmul.mubr.f32.gmra.mrb[8].mxu0 %v4934_v63  ;;  %756 = vmatmul.mubr.f32.vlgmr.msra.gmra.mrb[0].mxu1 %v4838_v8 }
  0x51   : > { %1224 = vmatprep.mubr.f32.mxu0 %v5850_v1  ;;  %761 = vmatprep.mubr.f32.mxu1 %v5850_v1 }
  0x52   : > { %4170 = vmatpush1.bf16.msra.mxu1 %v4169_v43  ;;  %v452_v43 = vld [vmem:[%s5841_s2 + $0x20] sm:$0xff] }
  0x53   : > { %4172 = vmatprep.subr.bf16.mxu1 %v4171_v22  ;;  %v1599_v22 = vsub.f32 %v5138_v52, %v1598_v21  ;;  %v1388_v35 = vsel %vm464_vm0, %v452_v43, 0 }
  0x54   : > { %1226 = vmatmul.mubr.f32.gmra.mrb[10].mxu0 %v4945_v5  ;;  %763 = vmatmul.mubr.f32.gmra.mrb[2].mxu1 %v4845_v20  ;;  %v5212_v40 = vand.u32 4294901760, %v1388_v35 }
  0x55   : > { %1231 = vmatprep.mubr.f32.mxu0 %v5850_v1  ;;  %768 = vmatprep.mubr.f32.mxu1 %v5850_v1 }
  0x56   : > { %4174 = vmatpush1.bf16.msra.mxu1 %v4173_v27 }
  0x58   : > { %1233 = vmatmul.mubr.f32.gmra.mrb[12].mxu0 %v4956_v11  ;;  %770 = vmatmul.mubr.f32.gmra.mrb[4].mxu1 %v4896_v47 }
  0x59   : > { %1238 = vmatprep.mubr.f32.mxu0 %v5850_v1  ;;  %775 = vmatprep.mubr.f32.mxu1 %v5850_v1 }
  0x5c   : > { %1240 = vmatmul.mubr.f32.gmra.mrb[14].mxu0 %v4964_v15  ;;  %777 = vmatmul.mubr.f32.gmra.mrb[6].mxu1 %v4919_v57 }
  0x5d   : > { %1318 = vmatprep.mubr.f32.mxu0 %v5850_v1  ;;  %782 = vmatprep.mubr.f32.mxu1 %v5850_v1 }
  0x60   : > { %1320 = vmatmul.mubr.f32.vlgmr.msra.gmra.mrb[0].mxu0 %v4838_v8  ;;  %v448_v8 = vld [vmem:[%s5841_s2] sm:$0xff]  ;;  %784 = vmatmul.mubr.f32.gmra.mrb[8].mxu1 %v4934_v63 }
  0x61   : > { %1325 = vmatprep.mubr.f32.mxu0 %v5850_v1  ;;  %4202 = vmatpush1.bf16.msra.mxu0 %v5091_v30 }
  0x62   : > { %4204 = vmatprep.subr.bf16.mxu0 %v5093_v42  ;;  %789 = vmatprep.mubr.f32.mxu1 %v5850_v1 }
  0x64   : > { %1327 = vmatmul.mubr.f32.gmra.mrb[2].mxu0 %v4845_v20  ;;  %v1376_v20 = vsel %vm464_vm0, %v448_v8, 0  ;;  %791 = vmatmul.mubr.f32.gmra.mrb[10].mxu1 %v4945_v5 }
  0x65   : > { %1332 = vmatprep.mubr.f32.mxu0 %v5850_v1  ;;  %4206 = vmatpush1.bf16.msra.mxu0 %v5100_v60  ;;  %v5124_v61 = vand.u32 4294901760, %v1376_v20 }
  0x66   : > { %4208 = vmatprep.subr.bf16.mxu0 %v5103_v44  ;;  %796 = vmatprep.mubr.f32.mxu1 %v5850_v1 }
  0x68   : > { %1334 = vmatmul.mubr.f32.gmra.mrb[4].mxu0 %v4896_v47  ;;  %v1379_v47 = vsel %vm464_vm0, %v449_v48, 0  ;;  %798 = vmatmul.mubr.f32.gmra.mrb[12].mxu1 %v4956_v11  ;;  %v5222_v48 = vsub.f32 %v1385_v32, %v5189_v23 }
  0x69   : > { %1339 = vmatprep.mubr.f32.mxu0 %v5850_v1  ;;  %v5145_v7 = vand.u32 4294901760, %v1379_v47  ;;  %803 = vmatprep.mubr.f32.mxu1 %v5850_v1 }
  0x6b   : > { %v5165_v13 = vsub.f32 %v1379_v47, %v5145_v7 }
  0x6c   : > { %1341 = vmatmul.mubr.f32.gmra.mrb[6].mxu0 %v4919_v57  ;;  %v5143_v57 = vsub.f32 %v1376_v20, %v5124_v61  ;;  %805 = vmatmul.mubr.f32.gmra.mrb[14].mxu1 %v4964_v15  ;;  %v1496_v20 = vand.u32 4294901760, %v5198_v54 }
  0x6d   : > { %1346 = vmatprep.mubr.f32.mxu0 %v5850_v1  ;;  %891 = vmatprep.mubr.f32.mxu1 %v5850_v1  ;;  %v1485_v27 = vand.u32 4294901760, %v5165_v13 }
  0x6e   : > { %v1474_v38 = vand.u32 4294901760, %v5143_v57  ;;  %v1497_v43 = vsub.f32 %v5198_v54, %v1496_v20 }
  0x6f   : > { %v1486_v8 = vsub.f32 %v5165_v13, %v1485_v27 }
  0x70   : > { %1348 = vmatmul.mubr.f32.gmra.mrb[8].mxu0 %v4934_v63  ;;  %v5155_v63 = vsub.f32 %v436_v36, %v1409_v39  ;;  %894 = vmatmul.mubr.f32.vlgmr.msra.gmra.mrb[0].mxu1 %v4867_v33  ;;  %v1475_v24 = vsub.f32 %v5143_v57, %v1474_v38  ;;  %v453_v36 = vld [vmem:[%s5841_s2 + $0x28] sm:$0xff]  ;;  %v1600_v39 = vand.u32 4294901760, %v1599_v22  ;;  %v455_v22 = vld [vmem:[%s5841_s2 + $0x38] sm:$0xff] }
  0x71   : > { %1353 = vmatprep.mubr.f32.mxu0 %v5850_v1  ;;  %899 = vmatprep.mubr.f32.mxu1 %v5850_v1  ;;  %v1391_v58 = vsel %vm464_vm0, %v453_v36, 0  ;;  %v1487_v32 = vand.u32 4294901760, %v1486_v8  ;;  %v1498_v36 = vand.u32 4294901760, %v1497_v43 }
  0x72   : > { %v1592_v49 = vand.u32 4294901760, %v5155_v63  ;;  %v1476_v59 = vand.u32 4294901760, %v1475_v24  ;;  %v5231_v12 = vpack.c.bf16 %v1600_v39, %v1588_v29  ;;  %v5233_v9 = vand.u32 4294901760, %v1391_v58 }
  0x73   : > { %v5255_v24 = vpack.c.bf16 %v5056_v31, %v5053_v25  ;;  %v2287_v25 = vld [vmem:[%s5845_s6 + $0x10] sm:$0xff]  ;;  %v2288_v31 = vld [vmem:[%s5845_s6 + $0x18] sm:$0xff] }
  0x74   : > { %1355 = vmatmul.mubr.f32.gmra.mrb[10].mxu0 %v4945_v5  ;;  %v1569_v5 = vsub.f32 %v5132_v2, %v1568_v16  ;;  %v1593_v37 = vsub.f32 %v5155_v63, %v1592_v49  ;;  %902 = vmatmul.mubr.f32.gmra.mrb[2].mxu1 %v4894_v46  ;;  %v1606_v46 = vand.u32 4294901760, %v1605_v55  ;;  %v1397_v55 = vsel %vm464_vm0, %v455_v22, 0 }
  0x75   : > { %1360 = vmatprep.mubr.f32.mxu0 %v5850_v1  ;;  %907 = vmatprep.mubr.f32.mxu1 %v5850_v1  ;;  %v5315_v22 = vpack.c.bf16 %v5138_v52, %v5136_v6 }
  0x76   : > { %v1570_v33 = vand.u32 4294901760, %v1569_v5  ;;  %v1594_v0 = vand.u32 4294901760, %v1593_v37  ;;  %v1507_v5 = vand.u32 4294901760, %v5222_v48 }
  0x78   : > { %1362 = vmatmul.mubr.f32.gmra.mrb[12].mxu0 %v4956_v11  ;;  %v1582_v11 = vand.u32 4294901760, %v1581_v45  ;;  %910 = vmatmul.mubr.f32.gmra.mrb[4].mxu1 %v4917_v56  ;;  %v5241_v45 = vsub.f32 %v1388_v35, %v5212_v40  ;;  %v5247_v56 = vpack.c.bf16 %v1606_v46, %v1594_v0  ;;  %v5258_v35 = vsub.f32 %v1391_v58, %v5233_v9 }
  0x79   : > { %1367 = vmatprep.mubr.f32.mxu0 %v5850_v1  ;;  %915 = vmatprep.mubr.f32.mxu1 %v5850_v1 }
  0x7a   : > { %v5226_v47 = vpack.c.bf16 %v1582_v11, %v1570_v33  ;;  %v1508_v33 = vsub.f32 %v5222_v48, %v1507_v5  ;;  %v1518_v11 = vand.u32 4294901760, %v5241_v45 }
  0x7c   : > { %1369 = vmatmul.mubr.f32.gmra.mrb[14].mxu0 %v4964_v15  ;;  %v454_v15 = vld [vmem:[%s5841_s2 + $0x30] sm:$0xff]  ;;  %918 = vmatmul.mubr.f32.gmra.mrb[6].mxu1 %v4932_v62  ;;  %v1529_v62 = vand.u32 4294901760, %v5258_v35  ;;  %v1509_v29 = vand.u32 4294901760, %v1508_v33  ;;  %v1519_v39 = vsub.f32 %v5241_v45, %v1518_v11  ;;  %v2289_v33 = vld [vmem:[%s5845_s6 + $0x20] sm:$0xff] }
  0x7d   : > { %1471 = vmatprep.mubr.f32.mxu0 %v5850_v1  ;;  %v1394_v53 = vsel %vm464_vm0, %v454_v15, 0  ;;  %923 = vmatprep.mubr.f32.mxu1 %v5850_v1 }
  0x7e   : > { %v5265_v37 = vand.u32 4294901760, %v1394_v53  ;;  %v1520_v8 = vand.u32 4294901760, %v1519_v39  ;;  %v2290_v39 = vld [vmem:[%s5845_s6 + $0x28] sm:$0xff] }
  0x80   : > { %1477 = vmatmul.mubr.f32.vlgmr.msra.gmra.mrb[0].mxu0 %v1476_v59  ;;  %926 = vmatmul.mubr.f32.gmra.mrb[8].mxu1 %v4943_v4  ;;  %v5278_v58 = vsub.f32 %v1394_v53, %v5265_v37  ;;  %v5280_v59 = vand.u32 4294901760, %v1397_v55  ;;  %v1530_v4 = vsub.f32 %v5258_v35, %v1529_v62 }
  0x81   : > { %1482 = vmatprep.mubr.f32.mxu0 %v5850_v1  ;;  %4210 = vmatpush1.bf16.msra.mxu0 %v5226_v47 }
  0x82   : > { %4212 = vmatprep.subr.bf16.mxu0 %v5231_v12  ;;  %931 = vmatprep.mubr.f32.mxu1 %v5850_v1  ;;  %v1540_v0 = vand.u32 4294901760, %v5278_v58  ;;  %v5290_v46 = vsub.f32 %v1397_v55, %v5280_v59  ;;  %v1531_v15 = vand.u32 4294901760, %v1530_v4  ;;  %v2291_v55 = vld [vmem:[%s5845_s6 + $0x30] sm:$0xff]  ;;  %v5361_v4 = vpack.c.bf16 %v1574_v41, %v1562_v34  ;;  %v3865_v34 = vld [vmem:[%s5846_s7] sm:$0xff]  ;;  %v3866_v41 = vld [vmem:[%s5846_s7 + $0x8] sm:$0xff] }
  0x84   : > { %1488 = vmatmul.mubr.f32.gmra.mrb[2].mxu0 %v1487_v32  ;;  %934 = vmatmul.mubr.f32.gmra.mrb[10].mxu1 %v4954_v10  ;;  %v1541_v10 = vsub.f32 %v5278_v58, %v1540_v0  ;;  %v1551_v32 = vand.u32 4294901760, %v5290_v46 }
  0x85   : > { %1493 = vmatprep.mubr.f32.mxu0 %v5850_v1  ;;  %4214 = vmatpush1.bf16.msra.mxu0 %v5247_v56 }
  0x86   : > { %4216 = vmatprep.subr.bf16.mxu0 %v5255_v24  ;;  %939 = vmatprep.mubr.f32.mxu1 %v5850_v1  ;;  %v1542_v43 = vand.u32 4294901760, %v1541_v10  ;;  %v2286_v10 = vld [vmem:[%s5845_s6 + $0x8] sm:$0xff] }
  0x88   : > { %1499 = vmatmul.mubr.f32.gmra.mrb[4].mxu0 %v1498_v36  ;;  %942 = vmatmul.mubr.f32.gmra.mrb[12].mxu1 %v4962_v14  ;;  %v1552_v14 = vsub.f32 %v5290_v46, %v1551_v32  ;;  %v5322_v36 = vpack.c.bf16 %v5157_v26, %v5155_v63 }
  0x89   : > { %1504 = vmatprep.mubr.f32.mxu0 %v5850_v1  ;;  %947 = vmatprep.mubr.f32.mxu1 %v5850_v1 }
  0x8a   : > { %v1553_v53 = vand.u32 4294901760, %v1552_v14  ;;  %v3868_v14 = vld [vmem:[%s5846_s7 + $0x18] sm:$0xff] }
  0x8c   : > { %1510 = vmatmul.mubr.f32.gmra.mrb[6].mxu0 %v1509_v29  ;;  %950 = vmatmul.mubr.f32.gmra.mrb[14].mxu1 %v4970_v18  ;;  %v5311_v18 = vpack.c.bf16 %v5134_v3, %v5132_v2  ;;  %v4748_v29 = vmov 0   ;;  %v5423_v2 = vpack.c.bf16 %v1604_v50, %v1592_v49 }
  0x8d   : > { %1515 = vmatprep.mubr.f32.mxu0 %v5850_v1  ;;  %2545 = vmatprep.mubr.f32.mxu1 %v5850_v1 }
  0x8e   : > { %4633 = vset.pattern.permute.xlu0 %v4748_v29  ;;  %4634 = vset.pattern.permute.xlu1 %v4748_v29 }
  0x8f   : > { %2315 = vperm.xlu0 %4633, %v2289_v33   ;;  %2325 = vperm.xlu1 %4634, %v2291_v55   ;;  %v5413_v33 = vpack.c.bf16 %v1598_v21, %v1586_v28 }
  0x90   : > { %1521 = vmatmul.mubr.f32.gmra.mrb[8].mxu0 %v1520_v8  ;;  %v2292_v8 = vld [vmem:[%s5845_s6 + $0x38] sm:$0xff] }
  0x91   : > { %1526 = vmatprep.mubr.f32.mxu0 %v5850_v1 }
  0x93   : > { %2320 = vperm.xlu0 %4633, %v2290_v39   ;;  %2330 = vperm.xlu1 %4634, %v2292_v8  }
  0x94   : > { %1532 = vmatmul.mubr.f32.gmra.mrb[10].mxu0 %v1531_v15  ;;  %v2285_v15 = vld [vmem:[%s5845_s6] sm:$0xff] }
  0x95   : > { %1537 = vmatprep.mubr.f32.mxu0 %v5850_v1 }
  0x97   : > { %2295 = vperm.xlu0 %4633, %v2285_v15   ;;  %2300 = vperm.xlu1 %4634, %v2286_v10  }
  0x98   : > { %1543 = vmatmul.mubr.f32.gmra.mrb[12].mxu0 %v1542_v43  ;;  %v3867_v43 = vld [vmem:[%s5846_s7 + $0x10] sm:$0xff] }
  0x99   : > { %1548 = vmatprep.mubr.f32.mxu0 %v5850_v1 }
  0x9b   : > { %2305 = vperm.xlu0 %4633, %v2287_v25   ;;  %2310 = vperm.xlu1 %4634, %v2288_v31  }
  0x9c   : > { %1554 = vmatmul.mubr.f32.gmra.mrb[14].mxu0 %v1553_v53  ;;  %v5407_v53 = vpack.c.bf16 %v1580_v19, %v1568_v16 }
  0x9d   : > { %1664 = vmatprep.mubr.f32.mxu0 %v5850_v1 }
  0x9f   : > { %3871 = vperm.xlu0 %4633, %v3865_v34   ;;  %3876 = vperm.xlu1 %4634, %v3866_v41  }
  0xa0   : > { %1666 = vmatmul.mubr.f32.vlgmr.msra.gmra.mrb[0].mxu0 %v5124_v61 }
  0xa1   : > { %1671 = vmatprep.mubr.f32.mxu0 %v5850_v1  ;;  %4218 = vmatpush1.bf16.msra.mxu0 %v5311_v18 }
  0xa2   : > { %4220 = vmatprep.subr.bf16.mxu0 %v5315_v22 }
  0xa3   : > { %3881 = vperm.xlu0 %4633, %v3867_v43   ;;  %3886 = vperm.xlu1 %4634, %v3868_v14  }
  0xa4   : > { %1673 = vmatmul.mubr.f32.gmra.mrb[2].mxu0 %v5145_v7 }
  0xa5   : > { %1678 = vmatprep.mubr.f32.mxu0 %v5850_v1  ;;  %4222 = vmatpush1.bf16.msra.mxu0 %v5322_v36 }
  0xa6   : > { %4224 = vmatprep.subr.bf16.mxu0 %v5029_v51 }
  0xa8   : > { %1680 = vmatmul.mubr.f32.gmra.mrb[4].mxu0 %v5167_v17 }
  0xa9   : > { %1685 = vmatprep.mubr.f32.mxu0 %v5850_v1 }
  0xac   : > { %1687 = vmatmul.mubr.f32.gmra.mrb[6].mxu0 %v5189_v23 }
  0xad   : > { %1692 = vmatprep.mubr.f32.mxu0 %v5850_v1 }
  0xb0   : > { %1694 = vmatmul.mubr.f32.gmra.mrb[8].mxu0 %v5212_v40 }
  0xb1   : > { %1699 = vmatprep.mubr.f32.mxu0 %v5850_v1 }
  0xb4   : > { %1701 = vmatmul.mubr.f32.gmra.mrb[10].mxu0 %v5233_v9 }
  0xb5   : > { %1706 = vmatprep.mubr.f32.mxu0 %v5850_v1 }
  0xb8   : > { %1708 = vmatmul.mubr.f32.gmra.mrb[12].mxu0 %v5265_v37 }
  0xb9   : > { %1713 = vmatprep.mubr.f32.mxu0 %v5850_v1 }
  0xbc   : > { %1715 = vmatmul.mubr.f32.gmra.mrb[14].mxu0 %v5280_v59 }
  0xbd   : > { %1801 = vmatprep.mubr.f32.mxu0 %v5850_v1 }
  0xc0   : > { %1804 = vmatmul.mubr.f32.vlgmr.msra.gmra.mrb[0].mxu0 %v5143_v57 }
  0xc1   : > { %1809 = vmatprep.mubr.f32.mxu0 %v5850_v1  ;;  %4226 = vmatpush1.bf16.msra.mxu0 %v5091_v30 }
  0xc2   : > { %4228 = vmatprep.subr.bf16.mxu0 %v5093_v42 }
  0xc4   : > { %1812 = vmatmul.mubr.f32.gmra.mrb[2].mxu0 %v5165_v13 }
  0xc5   : > { %1817 = vmatprep.mubr.f32.mxu0 %v5850_v1  ;;  %4230 = vmatpush1.bf16.msra.mxu0 %v5100_v60 }
  0xc6   : > { %4232 = vmatprep.subr.bf16.mxu0 %v5361_v4 }
  0xc8   : > { %1820 = vmatmul.mubr.f32.gmra.mrb[4].mxu0 %v5198_v54 }
  0xc9   : > { %1825 = vmatprep.mubr.f32.mxu0 %v5850_v1 }
  0xcc   : > { %1828 = vmatmul.mubr.f32.gmra.mrb[6].mxu0 %v5222_v48 }
  0xcd   : > { %1833 = vmatprep.mubr.f32.mxu0 %v5850_v1 }
  0xd0   : > { %1836 = vmatmul.mubr.f32.gmra.mrb[8].mxu0 %v5241_v45 }
  0xd1   : > { %1841 = vmatprep.mubr.f32.mxu0 %v5850_v1 }
  0xd4   : > { %1844 = vmatmul.mubr.f32.gmra.mrb[10].mxu0 %v5258_v35 }
  0xd5   : > { %1849 = vmatprep.mubr.f32.mxu0 %v5850_v1 }
  0xd8   : > { %1852 = vmatmul.mubr.f32.gmra.mrb[12].mxu0 %v5278_v58 }
  0xd9   : > { %1857 = vmatprep.mubr.f32.mxu0 %v5850_v1 }
  0xdc   : > { %1860 = vmatmul.mubr.f32.gmra.mrb[14].mxu0 %v5290_v46 }
  0xdd   : > { %1938 = vmatprep.mubr.f32.mxu0 %v5850_v1 }
  0xe0   : > { %1942 = vmatmul.mubr.f32.vlgmr.msra.gmra.mrb[0].mxu0 %v1474_v38 }
  0xe1   : > { %1947 = vmatprep.mubr.f32.mxu0 %v5850_v1  ;;  %4234 = vmatpush1.bf16.msra.mxu0 %v5407_v53 }
  0xe2   : > { %4236 = vmatprep.subr.bf16.mxu0 %v5413_v33 }
  0xe4   : > { %1951 = vmatmul.mubr.f32.gmra.mrb[2].mxu0 %v1485_v27 }
  0xe5   : > { %1956 = vmatprep.mubr.f32.mxu0 %v5850_v1  ;;  %4238 = vmatpush1.bf16.msra.mxu0 %v5423_v2 }
  0xe6   : > { %4240 = vmatprep.subr.bf16.mxu0 %v5029_v51 }
  0xe8   : > { %1960 = vmatmul.mubr.f32.gmra.mrb[4].mxu0 %v1496_v20 }
  0xe9   : > { %1965 = vmatprep.mubr.f32.mxu0 %v5850_v1 }
  0xec   : > { %1969 = vmatmul.mubr.f32.gmra.mrb[6].mxu0 %v1507_v5 }
  0xed   : > { %1974 = vmatprep.mubr.f32.mxu0 %v5850_v1 }
  0xf0   : > { %1978 = vmatmul.mubr.f32.gmra.mrb[8].mxu0 %v1518_v11 }
  0xf1   : > { %1983 = vmatprep.mubr.f32.mxu0 %v5850_v1 }
  0xf4   : > { %1987 = vmatmul.mubr.f32.gmra.mrb[10].mxu0 %v1529_v62 }
  0xf5   : > { %1992 = vmatprep.mubr.f32.mxu0 %v5850_v1 }
  0xf8   : > { %1996 = vmatmul.mubr.f32.gmra.mrb[12].mxu0 %v1540_v0 }
  0xf9   : > { %2001 = vmatprep.mubr.f32.mxu0 %v5850_v1 }
  0xfc   : > { %2005 = vmatmul.mubr.f32.gmra.mrb[14].mxu0 %v1551_v32 }
  0xfd   : > { %2099 = vmatprep.mubr.f32.mxu0 %v5850_v1 }
 0x100   : > { %2101 = vmatmul.mubr.f32.vlgmr.msra.gmra.mrb[0].mxu0 %v5124_v61 }
 0x101   : > { %2106 = vmatprep.mubr.f32.mxu0 %v5850_v1  ;;  %4242 = vmatpush1.bf16.msra.mxu0 %v5091_v30 }
 0x102   : > { %4244 = vmatprep.subr.bf16.mxu0 %v5093_v42 }
 0x104   : > { %2108 = vmatmul.mubr.f32.gmra.mrb[2].mxu0 %v5145_v7 }
 0x105   : > { %2113 = vmatprep.mubr.f32.mxu0 %v5850_v1  ;;  %4246 = vmatpush1.bf16.msra.mxu0 %v5100_v60 }
 0x108   : > { %2115 = vmatmul.mubr.f32.gmra.mrb[4].mxu0 %v5167_v17 }
 0x109   : > { %2120 = vmatprep.mubr.f32.mxu0 %v5850_v1 }
 0x10c   : > { %2122 = vmatmul.mubr.f32.gmra.mrb[6].mxu0 %v5189_v23 }
 0x10d   : > { %2127 = vmatprep.mubr.f32.mxu0 %v5850_v1 }
 0x10e   : > { %v2316_v0 = vpop.permute.xlu0 %2315 }
 0x110   : > { %2129 = vmatmul.mubr.f32.gmra.mrb[8].mxu0 %v5212_v40 }
 0x111   : > { %2134 = vmatprep.mubr.f32.mxu0 %v5850_v1 }
 0x112   : > { %v2321_v34 = vpop.permute.xlu0 %2320 }
 0x114   : > { %2136 = vmatmul.mubr.f32.gmra.mrb[10].mxu0 %v5233_v9 }
 0x115   : > { %2141 = vmatprep.mubr.f32.mxu0 %v5850_v1 }
 0x118   : > { %2143 = vmatmul.mubr.f32.gmra.mrb[12].mxu0 %v5265_v37 }
 0x119   : > { %2148 = vmatprep.mubr.f32.mxu0 %v5850_v1 }
 0x11c   : > { %2150 = vmatmul.mubr.f32.gmra.mrb[14].mxu0 %v5280_v59 }
 0x11d   : > { %2228 = vmatprep.mubr.f32.mxu0 %v5850_v1 }
 0x120   : > { %2230 = vmatmul.mubr.f32.vlgmr.msra.gmra.mrb[0].mxu0 %v5124_v61 }
 0x121   : > { %2235 = vmatprep.mubr.f32.mxu0 %v5850_v1 }
 0x124   : > { %2237 = vmatmul.mubr.f32.gmra.mrb[2].mxu0 %v5145_v7 }
 0x125   : > { %2242 = vmatprep.mubr.f32.mxu0 %v5850_v1 }
 0x128   : > { %2244 = vmatmul.mubr.f32.gmra.mrb[4].mxu0 %v5167_v17 }
 0x129   : > { %2249 = vmatprep.mubr.f32.mxu0 %v5850_v1 }
 0x12c   : > { %2251 = vmatmul.mubr.f32.gmra.mrb[6].mxu0 %v5189_v23 }
 0x12d   : > { %2256 = vmatprep.mubr.f32.mxu0 %v5850_v1 }
 0x130   : > { %2258 = vmatmul.mubr.f32.gmra.mrb[8].mxu0 %v5212_v40 }
 0x131   : > { %2263 = vmatprep.mubr.f32.mxu0 %v5850_v1 }
 0x134   : > { %2265 = vmatmul.mubr.f32.gmra.mrb[10].mxu0 %v5233_v9 }
 0x135   : > { %2270 = vmatprep.mubr.f32.mxu0 %v5850_v1 }
 0x138   : > { %2272 = vmatmul.mubr.f32.gmra.mrb[12].mxu0 %v5265_v37 }
 0x139   : > { %2277 = vmatprep.mubr.f32.mxu0 %v5850_v1 }
 0x13c   : > { %2279 = vmatmul.mubr.f32.gmra.mrb[14].mxu0 %v5280_v59 }
 0x143   : > { %v895_v61 = vpop.f32.mrb[0].mxu1 }
 0x144   : > { %v897_v3 = vpop.f32.mrb[1].mxu1 }
 0x147   : > { %v903_v6 = vpop.f32.mrb[2].mxu1 }
 0x148   : > { %v905_v52 = vpop.f32.mrb[3].mxu1 }
 0x14b   : > { %v911_v57 = vpop.f32.mrb[4].mxu1 }
 0x14c   : > { %v913_v7 = vpop.f32.mrb[5].mxu1 }
 0x14f   : > { %v919_v16 = vpop.f32.mrb[6].mxu1 }
 0x150   : > { %v921_v19 = vpop.f32.mrb[7].mxu1 }
 0x153   : > { %v927_v63 = vpop.f32.mrb[8].mxu1 }
 0x154   : > { %v929_v26 = vpop.f32.mrb[9].mxu1 }
 0x157   : > { %v935_v28 = vpop.f32.mrb[10].mxu1 }
 0x158   : > { %v937_v21 = vpop.f32.mrb[11].mxu1 }
 0x15b   : > { %v943_v38 = vpop.f32.mrb[12].mxu1 }
 0x15c   : > { %v945_v13 = vpop.f32.mrb[13].mxu1 }
 0x15f   : > { %v951_v17 = vpop.f32.mrb[14].mxu1 }
 0x160   : > { %v953_v49 = vpop.f32.mrb[15].mxu1 }
 0x1f3   : > { %v2231_v50 = vpop.f32.mrb[0].mxu0 }
 0x1f4   : > { %v5483_v23 = vadd.f32 %v2231_v50, %v895_v61  ;;  %v2233_v27 = vpop.f32.mrb[1].mxu0  ;;  %v2326_v61 = vpop.permute.xlu1 %2325 }
 0x1f5   : > { %v5485_v54 = vadd.f32 %v2233_v27, %v897_v3 }
 0x1f7   : > { %v2238_v40 = vpop.f32.mrb[2].mxu0 }
 0x1f8   : > { %v5487_v20 = vadd.f32 %v2238_v40, %v903_v6  ;;  %v2240_v48 = vpop.f32.mrb[3].mxu0 }
 0x1f9   : > { %v5489_v9 = vadd.f32 %v2240_v48, %v905_v52  ;;  %v2331_v48 = vpop.permute.xlu1 %2330 }
 0x1fb   : > { %v2245_v5 = vpop.f32.mrb[4].mxu0 }
 0x1fc   : > { %v5491_v45 = vadd.f32 %v2245_v5, %v911_v57  ;;  %v2247_v35 = vpop.f32.mrb[5].mxu0 }
 0x1fd   : > { %v5493_v11 = vadd.f32 %v2247_v35, %v913_v7 }
 0x1fe   : > { %5860 = vst [vmem:[#allocation2_spill] sm:$0xff] %v5491_v45 }
 0x1ff   : > { %5861 = vst [vmem:[#allocation3_spill] sm:$0xff] %v5493_v11  ;;  %v2252_v37 = vpop.f32.mrb[6].mxu0 }
 0x200   : > { %v5495_v62 = vadd.f32 %v2252_v37, %v919_v16  ;;  %v2254_v58 = vpop.f32.mrb[7].mxu0 }
 0x201   : > { %v5497_v59 = vadd.f32 %v2254_v58, %v921_v19 }
 0x202   : > { %5862 = vst [vmem:[#allocation4_spill] sm:$0xff] %v5495_v62 }
 0x203   : > { %5863 = vst [vmem:[#allocation5_spill] sm:$0xff] %v5497_v59  ;;  %v2259_v46 = vpop.f32.mrb[8].mxu0 }
 0x204   : > { %v4351_v32 = vadd.f32 %v2259_v46, %v927_v63  ;;  %v2261_v55 = vpop.f32.mrb[9].mxu0 }
 0x205   : > { %v4352_v29 = vadd.f32 %v2261_v55, %v929_v26 }
 0x206   : > { %v2341_v39 = vadd.f32 %v4351_v32, %v2316_v0 }
 0x207   : > { %v2342_v8 = vadd.f32 %v4352_v29, %v2316_v0  ;;  %v2266_v15 = vpop.f32.mrb[10].mxu0 }
 0x208   : > { %v4137_v10 = vmul.f32 -1.442695, %v2341_v39  ;;  %v4353_v25 = vadd.f32 %v2266_v15, %v935_v28  ;;  %v2268_v31 = vpop.f32.mrb[11].mxu0 }
 0x209   : > { %v4138_v41 = vmul.f32 -1.442695, %v2342_v8  ;;  %v4354_v43 = vadd.f32 %v2268_v31, %v937_v21 }
 0x20a   : > { %4635 = vpow2.f32 %v4137_v10  ;;  %v2343_v14 = vadd.f32 %v4353_v25, %v2321_v34  ;;  %v2458_v25 = vld [vmem:[%s5844_s5 + $0x8] sm:$0xff] }
 0x20b   : > { %v2344_v3 = vadd.f32 %v4354_v43, %v2321_v34  ;;  %v2273_v6 = vpop.f32.mrb[12].mxu0  ;;  %4637 = vpow2.f32 %v4138_v41  ;;  %v2465_v43 = vsel %vm464_vm0, %v2458_v25, 0 }
 0x20c   : > { %v4139_v52 = vmul.f32 -1.442695, %v2343_v14  ;;  %v4355_v57 = vadd.f32 %v2273_v6, %v943_v38  ;;  %v2275_v7 = vpop.f32.mrb[13].mxu0 }
 0x20d   : > { %v4140_v16 = vmul.f32 -1.442695, %v2344_v3  ;;  %v4356_v19 = vadd.f32 %v2275_v7, %v945_v13  ;;  %v5510_v3 = vld [vmem:[%s4832_s20] sm:$0xff] }
 0x20e   : > { %4639 = vpow2.f32 %v4139_v52  ;;  %v2345_v63 = vadd.f32 %v4355_v57, %v2326_v61  ;;  %5864 = vst [vmem:[#allocation6_spill] sm:$0xff] %v5510_v3 }
 0x20f   : > { %v2346_v26 = vadd.f32 %v4356_v19, %v2326_v61  ;;  %v2280_v50 = vpop.f32.mrb[14].mxu0  ;;  %4641 = vpow2.f32 %v4140_v16  ;;  %v5516_v16 = vand.u32 4294901760, %v2465_v43 }
 0x210   : > { %v4141_v28 = vmul.f32 -1.442695, %v2345_v63  ;;  %v4357_v27 = vadd.f32 %v2280_v50, %v951_v17  ;;  %v2282_v40 = vpop.f32.mrb[15].mxu0  ;;  %v2457_v17 = vld [vmem:[%s5844_s5] sm:$0xff] }
 0x211   : > { %v4142_v21 = vmul.f32 -1.442695, %v2346_v26  ;;  %v4358_v5 = vadd.f32 %v2282_v40, %v953_v49  ;;  %v2462_v15 = vsel %vm464_vm0, %v2457_v17, 0  ;;  %v5523_v40 = vld [vmem:[%s4832_s20 + $0x10] sm:$0xff] }
 0x212   : > { %4643 = vpow2.f32 %v4141_v28  ;;  %v2347_v35 = vadd.f32 %v4357_v27, %v2331_v48  ;;  %v5506_v41 = vand.u32 4294901760, %v2462_v15  ;;  %v5519_v28 = vld [vmem:[%s4832_s20 + $0x8] sm:$0xff]  ;;  %5866 = vst [vmem:[#allocation8_spill] sm:$0xff] %v5523_v40 }
 0x213   : > { %v2348_v37 = vadd.f32 %v4358_v5, %v2331_v48  ;;  %4645 = vpow2.f32 %v4142_v21  ;;  %5865 = vst [vmem:[#allocation7_spill] sm:$0xff] %v5519_v28 }
 0x214   : > { %v4636_v58 = vpop.eup %4635  ;;  %v4143_v38 = vmul.f32 -1.442695, %v2347_v35  ;;  %v5514_v7 = vsub.f32 %v2462_v15, %v5506_v41 }
 0x215   : > { %v2421_v0 = vadd.f32 1.0, %v4636_v58  ;;  %v4144_v46 = vmul.f32 -1.442695, %v2348_v37  ;;  %v4638_v13 = vpop.eup %4637  ;;  %v5530_v37 = vsub.f32 %v2465_v43, %v5516_v16  ;;  %v2459_v58 = vld [vmem:[%s5844_s5 + $0x10] sm:$0xff]  ;;  %v5594_v43 = vld [vmem:[%s4832_s20 + $0x38] sm:$0xff] }
 0x216   : > { %v2422_v55 = vadd.f32 1.0, %v4638_v13  ;;  %v5849_v35 = vand.u32 4294901760, %v5514_v7  ;;  %v2468_v15 = vsel %vm464_vm0, %v2459_v58, 0  ;;  %5871 = vst [vmem:[#allocation13_spill] sm:$0xff] %v5594_v43 }
 0x217   : > { %4647 = vrcp.f32 %v2421_v0 }
 0x218   : > { %v4640_v32 = vpop.eup %4639  ;;  %4649 = vpow2.f32 %v4143_v38 }
 0x219   : > { %v2423_v29 = vadd.f32 1.0, %v4640_v32  ;;  %4651 = vpow2.f32 %v4144_v46  ;;  %v4642_v49 = vpop.eup %4641  ;;  %v5537_v32 = vld [vmem:[%s4832_s20 + $0x18] sm:$0xff] }
 0x21a   : > { %4653 = vrcp.f32 %v2422_v55  ;;  %v2424_v8 = vadd.f32 1.0, %v4642_v49  ;;  %5867 = vst [vmem:[#allocation9_spill] sm:$0xff] %v5537_v32 }
 0x21b   : > { %4655 = vrcp.f32 %v2423_v29 }
 0x21c   : > { %v4644_v39 = vpop.eup %4643  ;;  %4657 = vrcp.f32 %v2424_v8 }
 0x21d   : > { %v2425_v10 = vadd.f32 1.0, %v4644_v39  ;;  %v4646_v31 = vpop.eup %4645  ;;  %v5547_v39 = vld [vmem:[%s4832_s20 + $0x20] sm:$0xff] }
 0x21e   : > { %v2426_v34 = vadd.f32 1.0, %v4646_v31  ;;  %5868 = vst [vmem:[#allocation10_spill] sm:$0xff] %v5547_v39 }
 0x21f   : > { %4659 = vrcp.f32 %v2425_v10 }
 0x220   : > { %4661 = vrcp.f32 %v2426_v34  ;;  %v5555_v34 = vsub.f32 %v5514_v7, %v5849_v35 }
 0x221   : > { %v4648_v14 = vpop.eup %4647 }
 0x222   : > { %v4650_v61 = vpop.eup %4649  ;;  %v2445_v6 = vmul.f32 %v5510_v3, %v4648_v14  ;;  %v5559_v14 = vld [vmem:[%s4832_s20 + $0x28] sm:$0xff] }
 0x223   : > { %v4652_v52 = vpop.eup %4651  ;;  %v2427_v57 = vadd.f32 1.0, %v4650_v61  ;;  %5869 = vst [vmem:[#allocation11_spill] sm:$0xff] %v5559_v14 }
 0x224   : > { %v4654_v19 = vpop.eup %4653  ;;  %v2428_v63 = vadd.f32 1.0, %v4652_v52  ;;  %v2475_v26 = vand.u32 4294901760, %v2445_v6 }
 0x225   : > { %v4656_v50 = vpop.eup %4655  ;;  %4663 = vrcp.f32 %v2427_v57  ;;  %v2446_v27 = vmul.f32 %v5519_v28, %v4654_v19  ;;  %v2460_v19 = vld [vmem:[%s5844_s5 + $0x18] sm:$0xff] }
 0x226   : > { %4665 = vrcp.f32 %v2428_v63  ;;  %v2447_v48 = vmul.f32 %v5523_v40, %v4656_v50  ;;  %v5526_v21 = vsub.f32 %v2445_v6, %v2475_v26  ;;  %v4658_v38 = vpop.eup %4657  ;;  %v5571_v50 = vand.u32 4294901760, %v2468_v15 }
 0x227   : > { %v2473_v5 = vand.u32 4294901760, %v2446_v27  ;;  %v2448_v55 = vmul.f32 %v5537_v32, %v4658_v38 }
 0x228   : > { %v2479_v0 = vand.u32 4294901760, %v2447_v48  ;;  %v2598_v46 = vand.u32 4294901760, %v5526_v21 }
 0x229   : > { %v4660_v13 = vpop.eup %4659  ;;  %v5540_v29 = vsub.f32 %v2446_v27, %v2473_v5  ;;  %v2477_v25 = vand.u32 4294901760, %v2448_v55  ;;  %v5590_v27 = vld [vmem:[%s4832_s20 + $0x30] sm:$0xff] }
 0x22a   : > { %v5542_v17 = vpack.c.bf16 %v2479_v0, %v2475_v26  ;;  %v5544_v49 = vsub.f32 %v2447_v48, %v2479_v0  ;;  %v2449_v8 = vmul.f32 %v5547_v39, %v4660_v13  ;;  %v4662_v10 = vpop.eup %4661  ;;  %v2599_v52 = vsub.f32 %v5526_v21, %v2598_v46  ;;  %5870 = vst [vmem:[#allocation12_spill] sm:$0xff] %v5590_v27 }
 0x22b   : > { %v2592_v31 = vand.u32 4294901760, %v5540_v29  ;;  %v2450_v61 = vmul.f32 %v5559_v14, %v4662_v10  ;;  %v5567_v63 = vpack.c.bf16 %v2477_v25, %v2473_v5  ;;  %v5569_v26 = vsub.f32 %v2448_v55, %v2477_v25 }
 0x22c   : > { %v2483_v6 = vand.u32 4294901760, %v2449_v8  ;;  %v2610_v57 = vand.u32 4294901760, %v5544_v49  ;;  %v2471_v25 = vsel %vm464_vm0, %v2460_v19, 0 }
 0x22d   : > { %v2481_v48 = vand.u32 4294901760, %v2450_v61  ;;  %4248 = vmatprep.subr.bf16.mxu1 %v5567_v63  ;;  %v2593_v5 = vsub.f32 %v5540_v29, %v2592_v31  ;;  %v2604_v55 = vand.u32 4294901760, %v5569_v26  ;;  %v4263_v10 = vpack.c.bf16 %v5569_v26, %v5540_v29 }
 0x22e   : > { %v5575_v58 = vsub.f32 %v2449_v8, %v2483_v6  ;;  %v2611_v38 = vsub.f32 %v5544_v49, %v2610_v57  ;;  %v5578_v0 = vpack.c.bf16 %v2610_v57, %v2598_v46  ;;  %4250 = vmatpush1.bf16.msra.mxu1 %v5542_v17  ;;  %v2600_v57 = vand.u32 4294901760, %v2599_v52 }
 0x22f   : > { %v4664_v13 = vpop.eup %4663  ;;  %v5587_v8 = vsub.f32 %v2450_v61, %v2481_v48  ;;  %v2605_v39 = vsub.f32 %v5569_v26, %v2604_v55  ;;  %v5599_v29 = vsub.f32 %v2468_v15, %v5571_v50  ;;  %v5601_v19 = vpack.c.bf16 %v2604_v55, %v2592_v31 }
 0x230   : > { %v4666_v35 = vpop.eup %4665  ;;  %v2451_v46 = vmul.f32 %v5590_v27, %v4664_v13  ;;  %v2612_v1 = vand.u32 4294901760, %v2611_v38  ;;  %v2622_v40 = vand.u32 4294901760, %v5575_v58  ;;  %v5604_v28 = vand.u32 4294901760, %v2471_v25 }
 0x231   : > { %v2452_v14 = vmul.f32 %v5594_v43, %v4666_v35  ;;  %v2594_v52 = vand.u32 4294901760, %v2593_v5  ;;  %v2606_v38 = vand.u32 4294901760, %v2605_v39  ;;  %v2616_v27 = vand.u32 4294901760, %v5587_v8 }
 0x232   : > { %v2487_v32 = vand.u32 4294901760, %v2451_v46  ;;  %v4257_v61 = vpack.c.bf16 %v2612_v1, %v2600_v57  ;;  %v2550_v26 = vand.u32 4294901760, %v5555_v34  ;;  %v5872_v1 = vand.u32 4294901760, %v5530_v37 }
 0x233   : > { %v2485_v13 = vand.u32 4294901760, %v2452_v14  ;;  %v4255_v55 = vpack.c.bf16 %v2606_v38, %v2594_v52  ;;  %v2623_v43 = vsub.f32 %v5575_v58, %v2622_v40  ;;  %v5873_v11 = vand.u32 4294901760, %v5599_v29 }
 0x234   : > { %v5607_v3 = vpack.c.bf16 %v2487_v32, %v2483_v6  ;;  %v2633_v35 = vsub.f32 %v2451_v46, %v2487_v32  ;;  %v2560_v57 = vsub.f32 %v5530_v37, %v5872_v1  ;;  %v2617_v32 = vsub.f32 %v5587_v8, %v2616_v27 }
 0x235   : > { %v5610_v15 = vpack.c.bf16 %v2485_v13, %v2481_v48  ;;  %v2627_v31 = vsub.f32 %v2452_v14, %v2485_v13  ;;  %v5621_v6 = vsub.f32 %v2471_v25, %v5604_v28  ;;  %v2624_v1 = vand.u32 4294901760, %v2623_v43 }
 0x236   : > { %v2634_v59 = vand.u32 4294901760, %v2633_v35  ;;  %v4269_v5 = vpack.c.bf16 %v2633_v35, %v5575_v58  ;;  %v2561_v38 = vand.u32 4294901760, %v2560_v57  ;;  %v2618_v39 = vand.u32 4294901760, %v2617_v32 }
 0x237   : > { %4252 = vmatprep.subr.bf16.mxu1 %v5610_v15  ;;  %v2628_v34 = vand.u32 4294901760, %v2627_v31  ;;  %v4267_v14 = vpack.c.bf16 %v2627_v31, %v5587_v8  ;;  %v2571_v25 = vsub.f32 %v5599_v29, %v5873_v11  ;;  %v2581_v45 = vand.u32 4294901760, %v5621_v6 }
 0x238   : > { %4254 = vmatpush1.bf16.msra.mxu1 %v5607_v3  ;;  %v2635_v48 = vsub.f32 %v2633_v35, %v2634_v59  ;;  %v4285_v46 = vpack.c.bf16 %v2634_v59, %v2622_v40  ;;  %v5874_v8 = vmov 0.0   ;;  %v5875_v11 = vpack.c.bf16 %v5544_v49, %v5526_v21 }
 0x239   : > { %4256 = vmatprep.subr.bf16.mxu1 %v4255_v55  ;;  %v2629_v13 = vsub.f32 %v2627_v31, %v2628_v34  ;;  %v4283_v52 = vpack.c.bf16 %v2628_v34, %v2616_v27  ;;  %v2572_v40 = vand.u32 4294901760, %v2571_v25  ;;  %v2582_v43 = vsub.f32 %v5621_v6, %v2581_v45 }
 0x23a   : > { %v2636_v58 = vand.u32 4294901760, %v2635_v48  ;;  %v5877_v21 = vand.u32 4294901760, %v5530_v37  ;;  %v5878_v49 = vand.u32 4294901760, %v5599_v29 }
 0x23b   : > { %2551 = vmatmul.mubr.f32.vlgmr.msra.gmra.mrb[16].mxu1 %v2550_v26  ;;  %v2630_v62 = vand.u32 4294901760, %v2629_v13  ;;  %v2583_v27 = vand.u32 4294901760, %v2582_v43 }
 0x23c   : > { %4258 = vmatpush1.bf16.msra.mxu1 %v4257_v61  ;;  %2556 = vmatprep.mubr.f32.mxu1 %v5874_v8  ;;  %v4261_v35 = vpack.c.bf16 %v2636_v58, %v2624_v1 }
 0x23d   : > { %v4259_v59 = vpack.c.bf16 %v2630_v62, %v2618_v39  ;;  %v5876_v62 = vand.u32 4294901760, %v5514_v7 }
 0x23f   : > { %2562 = vmatmul.mubr.f32.gmra.mrb[18].mxu1 %v2561_v38  ;;  %4260 = vmatprep.subr.bf16.mxu1 %v4259_v59 }
 0x240   : > { %4262 = vmatpush1.bf16.msra.mxu1 %v4261_v35  ;;  %2567 = vmatprep.mubr.f32.mxu1 %v5874_v8 }
 0x241   : > { %4264 = vmatprep.subr.bf16.mxu1 %v4263_v10 }
 0x243   : > { %2573 = vmatmul.mubr.f32.gmra.mrb[20].mxu1 %v2572_v40 }
 0x244   : > { %2578 = vmatprep.mubr.f32.mxu1 %v5874_v8 }
 0x247   : > { %2584 = vmatmul.mubr.f32.gmra.mrb[22].mxu1 %v2583_v27 }
 0x248   : > { %2694 = vmatprep.mubr.f32.mxu1 %v5874_v8 }
 0x24b   : > { %2696 = vmatmul.mubr.f32.vlgmr.msra.gmra.mrb[16].mxu1 %v5506_v41 }
 0x24c   : > { %4266 = vmatpush1.bf16.msra.mxu1 %v5875_v11  ;;  %2701 = vmatprep.mubr.f32.mxu1 %v5874_v8 }
 0x24d   : > { %4268 = vmatprep.subr.bf16.mxu1 %v4267_v14 }
 0x24f   : > { %2703 = vmatmul.mubr.f32.gmra.mrb[18].mxu1 %v5516_v16 }
 0x250   : > { %4270 = vmatpush1.bf16.msra.mxu1 %v4269_v5  ;;  %2708 = vmatprep.mubr.f32.mxu1 %v5874_v8 }
 0x251   : > { %4272 = vmatprep.subr.bf16.mxu1 %v5567_v63 }
 0x253   : > { %2710 = vmatmul.mubr.f32.gmra.mrb[20].mxu1 %v5571_v50 }
 0x254   : > { %2715 = vmatprep.mubr.f32.mxu1 %v5874_v8 }
 0x257   : > { %2717 = vmatmul.mubr.f32.gmra.mrb[22].mxu1 %v5604_v28 }
 0x258   : > { %2803 = vmatprep.mubr.f32.mxu1 %v5874_v8 }
 0x25b   : > { %2806 = vmatmul.mubr.f32.vlgmr.msra.gmra.mrb[16].mxu1 %v5514_v7 }
 0x25c   : > { %4274 = vmatpush1.bf16.msra.mxu1 %v5542_v17  ;;  %2811 = vmatprep.mubr.f32.mxu1 %v5874_v8 }
 0x25d   : > { %4276 = vmatprep.subr.bf16.mxu1 %v5610_v15 }
 0x25f   : > { %2814 = vmatmul.mubr.f32.gmra.mrb[18].mxu1 %v5530_v37  ;;  %v2454_v37 = vld [vmem:[%s5843_s4 + $0x8] sm:$0xff] }
 0x260   : > { %4278 = vmatpush1.bf16.msra.mxu1 %v5607_v3  ;;  %2819 = vmatprep.mubr.f32.mxu1 %v5874_v8 }
 0x261   : > { %4280 = vmatprep.subr.bf16.mxu1 %v5601_v19  ;;  %v2456_v19 = vld [vmem:[%s5843_s4 + $0x18] sm:$0xff] }
 0x263   : > { %2822 = vmatmul.mubr.f32.gmra.mrb[20].mxu1 %v5599_v29 }
 0x264   : > { %2827 = vmatprep.mubr.f32.mxu1 %v5874_v8 }
 0x267   : > { %2830 = vmatmul.mubr.f32.gmra.mrb[22].mxu1 %v5621_v6 }
 0x268   : > { %2908 = vmatprep.mubr.f32.mxu1 %v5874_v8 }
 0x26b   : > { %2912 = vmatmul.mubr.f32.vlgmr.msra.gmra.mrb[16].mxu1 %v5876_v62 }
 0x26c   : > { %4282 = vmatpush1.bf16.msra.mxu1 %v5578_v0  ;;  %2917 = vmatprep.mubr.f32.mxu1 %v5874_v8 }
 0x26d   : > { %4284 = vmatprep.subr.bf16.mxu1 %v4283_v52 }
 0x26f   : > { %2921 = vmatmul.mubr.f32.gmra.mrb[18].mxu1 %v5877_v21 }
 0x270   : > { %4286 = vmatpush1.bf16.msra.mxu1 %v4285_v46  ;;  %2926 = vmatprep.mubr.f32.mxu1 %v5874_v8 }
 0x271   : > { %4288 = vmatprep.subr.bf16.mxu1 %v5567_v63  ;;  %v2455_v63 = vld [vmem:[%s5843_s4 + $0x10] sm:$0xff] }
 0x272   : > { %v3170_v29 = vsel %vm464_vm0, %v2455_v63, 0 }
 0x273   : > { %2930 = vmatmul.mubr.f32.gmra.mrb[20].mxu1 %v5878_v49  ;;  %v5713_v26 = vand.u32 4294901760, %v3170_v29 }
 0x274   : > { %2935 = vmatprep.mubr.f32.mxu1 %v5874_v8 }
 0x275   : > { %v3271_v55 = vsub.f32 %v3170_v29, %v5713_v26 }
 0x277   : > { %2939 = vmatmul.mubr.f32.gmra.mrb[22].mxu1 %v2581_v45  ;;  %v2453_v45 = vld [vmem:[%s5843_s4] sm:$0xff]  ;;  %v3272_v32 = vand.u32 4294901760, %v3271_v55 }
 0x278   : > { %3033 = vmatprep.mubr.f32.mxu1 %v5874_v8  ;;  %v3164_v7 = vsel %vm464_vm0, %v2453_v45, 0 }
 0x279   : > { %v3273_v34 = vsub.f32 %v3271_v55, %v3272_v32 }
 0x27b   : > { %3035 = vmatmul.mubr.f32.vlgmr.msra.gmra.mrb[16].mxu1 %v5506_v41 }
 0x27c   : > { %4290 = vmatpush1.bf16.msra.mxu1 %v5542_v17  ;;  %3040 = vmatprep.mubr.f32.mxu1 %v5874_v8  ;;  %v3167_v17 = vsel %vm464_vm0, %v2454_v37, 0 }
 0x27d   : > { %4292 = vmatprep.subr.bf16.mxu1 %v5610_v15  ;;  %v5699_v10 = vand.u32 4294901760, %v3167_v17  ;;  %v3173_v15 = vsel %vm464_vm0, %v2456_v19, 0 }
 0x27e   : > { %v5723_v57 = vand.u32 4294901760, %v3173_v15 }
 0x27f   : > { %3042 = vmatmul.mubr.f32.gmra.mrb[18].mxu1 %v5516_v16  ;;  %v5711_v61 = vsub.f32 %v3167_v17, %v5699_v10 }
 0x280   : > { %4294 = vmatpush1.bf16.msra.mxu1 %v5607_v3  ;;  %3047 = vmatprep.mubr.f32.mxu1 %v5874_v8  ;;  %v5688_v3 = vand.u32 4294901760, %v3164_v7 }
 0x281   : > { %4296 = vmatprep.subr.bf16.mxu1 %v5029_v51 }
 0x282   : > { %v5697_v0 = vsub.f32 %v3164_v7, %v5688_v3 }
 0x283   : > { %3049 = vmatmul.mubr.f32.gmra.mrb[20].mxu1 %v5571_v50 }
 0x284   : > { %3054 = vmatprep.mubr.f32.mxu1 %v5874_v8 }
 0x287   : > { %3056 = vmatmul.mubr.f32.gmra.mrb[22].mxu1 %v5604_v28 }
 0x288   : > { %3134 = vmatprep.mubr.f32.mxu1 %v5874_v8 }
 0x28b   : > { %3136 = vmatmul.mubr.f32.vlgmr.msra.gmra.mrb[16].mxu1 %v5506_v41  ;;  %v3250_v41 = vand.u32 4294901760, %v5697_v0 }
 0x28c   : > { %3141 = vmatprep.mubr.f32.mxu1 %v5874_v8  ;;  %4298 = vmatpush1.bf16.msra.mxu1 %v5091_v30 }
 0x28d   : > { %4300 = vmatprep.subr.bf16.mxu1 %v5093_v42  ;;  %v3251_v31 = vsub.f32 %v5697_v0, %v3250_v41 }
 0x28f   : > { %3143 = vmatmul.mubr.f32.gmra.mrb[18].mxu1 %v5516_v16  ;;  %v3261_v16 = vand.u32 4294901760, %v5711_v61  ;;  %v3252_v39 = vand.u32 4294901760, %v3251_v31 }
 0x290   : > { %3148 = vmatprep.mubr.f32.mxu1 %v5874_v8  ;;  %4302 = vmatpush1.bf16.msra.mxu1 %v5100_v60 }
 0x291   : > { %4304 = vmatprep.subr.bf16.mxu1 %v5103_v44  ;;  %v3262_v5 = vsub.f32 %v5711_v61, %v3261_v16  ;;  %v3282_v44 = vsub.f32 %v3173_v15, %v5723_v57 }
 0x293   : > { %3150 = vmatmul.mubr.f32.gmra.mrb[20].mxu1 %v5571_v50  ;;  %v3263_v50 = vand.u32 4294901760, %v3262_v5  ;;  %v3283_v6 = vand.u32 4294901760, %v3282_v44 }
 0x294   : > { %3155 = vmatprep.mubr.f32.mxu1 %v5874_v8 }
 0x295   : > { %v3284_v14 = vsub.f32 %v3282_v44, %v3283_v6 }
 0x297   : > { %3157 = vmatmul.mubr.f32.gmra.mrb[22].mxu1 %v5604_v28  ;;  %v3274_v28 = vand.u32 4294901760, %v3273_v34  ;;  %v3285_v48 = vand.u32 4294901760, %v3284_v14 }
 0x298   : > { %3247 = vmatprep.mubr.f32.mxu1 %v5874_v8 }
 0x29b   : > { %3253 = vmatmul.mubr.f32.vlgmr.msra.gmra.mrb[16].mxu1 %v3252_v39 }
 0x29c   : > { %3258 = vmatprep.mubr.f32.mxu1 %v5874_v8  ;;  %4306 = vmatpush1.bf16.msra.mxu1 %v5226_v47 }
 0x29d   : > { %4308 = vmatprep.subr.bf16.mxu1 %v5231_v12 }
 0x29f   : > { %3264 = vmatmul.mubr.f32.gmra.mrb[18].mxu1 %v3263_v50 }
 0x2a0   : > { %3269 = vmatprep.mubr.f32.mxu1 %v5874_v8  ;;  %4310 = vmatpush1.bf16.msra.mxu1 %v5247_v56 }
 0x2a1   : > { %4312 = vmatprep.subr.bf16.mxu1 %v5255_v24 }
 0x2a3   : > { %3275 = vmatmul.mubr.f32.gmra.mrb[20].mxu1 %v3274_v28 }
 0x2a4   : > { %3280 = vmatprep.mubr.f32.mxu1 %v5874_v8 }
 0x2a7   : > { %3286 = vmatmul.mubr.f32.gmra.mrb[22].mxu1 %v3285_v48 }
 0x2a8   : > { %3396 = vmatprep.mubr.f32.mxu1 %v5874_v8 }
 0x2ab   : > { %3398 = vmatmul.mubr.f32.vlgmr.msra.gmra.mrb[16].mxu1 %v5688_v3 }
 0x2ac   : > { %3403 = vmatprep.mubr.f32.mxu1 %v5874_v8  ;;  %4314 = vmatpush1.bf16.msra.mxu1 %v5311_v18 }
 0x2ad   : > { %4316 = vmatprep.subr.bf16.mxu1 %v5315_v22 }
 0x2af   : > { %3405 = vmatmul.mubr.f32.gmra.mrb[18].mxu1 %v5699_v10 }
 0x2b0   : > { %3410 = vmatprep.mubr.f32.mxu1 %v5874_v8  ;;  %4318 = vmatpush1.bf16.msra.mxu1 %v5322_v36  ;;  %v5879_v36 = vld [vmem:[#allocation2_spill] sm:$0xff] }
 0x2b1   : > { %4320 = vmatprep.subr.bf16.mxu1 %v5029_v51 }
 0x2b3   : > { %3412 = vmatmul.mubr.f32.gmra.mrb[20].mxu1 %v5713_v26 }
 0x2b4   : > { %3417 = vmatprep.mubr.f32.mxu1 %v5874_v8 }
 0x2b7   : > { %3419 = vmatmul.mubr.f32.gmra.mrb[22].mxu1 %v5723_v57 }
 0x2b8   : > { %3505 = vmatprep.mubr.f32.mxu1 %v5874_v8 }
 0x2bb   : > { %3508 = vmatmul.mubr.f32.vlgmr.msra.gmra.mrb[16].mxu1 %v5697_v0 }
 0x2bc   : > { %3513 = vmatprep.mubr.f32.mxu1 %v5874_v8  ;;  %4322 = vmatpush1.bf16.msra.mxu1 %v5091_v30 }
 0x2bd   : > { %4324 = vmatprep.subr.bf16.mxu1 %v5093_v42 }
 0x2bf   : > { %3516 = vmatmul.mubr.f32.gmra.mrb[18].mxu1 %v5711_v61 }
 0x2c0   : > { %3521 = vmatprep.mubr.f32.mxu1 %v5874_v8  ;;  %4326 = vmatpush1.bf16.msra.mxu1 %v5100_v60 }
 0x2c1   : > { %4328 = vmatprep.subr.bf16.mxu1 %v5361_v4 }
 0x2c3   : > { %3524 = vmatmul.mubr.f32.gmra.mrb[20].mxu1 %v3271_v55 }
 0x2c4   : > { %3529 = vmatprep.mubr.f32.mxu1 %v5874_v8 }
 0x2c7   : > { %3532 = vmatmul.mubr.f32.gmra.mrb[22].mxu1 %v3282_v44 }
 0x2c8   : > { %3610 = vmatprep.mubr.f32.mxu1 %v5874_v8 }
 0x2cb   : > { %3614 = vmatmul.mubr.f32.vlgmr.msra.gmra.mrb[16].mxu1 %v3250_v41 }
 0x2cc   : > { %3619 = vmatprep.mubr.f32.mxu1 %v5874_v8  ;;  %4330 = vmatpush1.bf16.msra.mxu1 %v5407_v53 }
 0x2cd   : > { %4332 = vmatprep.subr.bf16.mxu1 %v5413_v33  ;;  %v5880_v33 = vld [vmem:[#allocation3_spill] sm:$0xff] }
 0x2cf   : > { %3623 = vmatmul.mubr.f32.gmra.mrb[18].mxu1 %v3261_v16 }
 0x2d0   : > { %3628 = vmatprep.mubr.f32.mxu1 %v5874_v8  ;;  %4334 = vmatpush1.bf16.msra.mxu1 %v5423_v2 }
 0x2d1   : > { %4336 = vmatprep.subr.bf16.mxu1 %v5029_v51  ;;  %v2296_v51 = vpop.permute.xlu0 %2295 }
 0x2d3   : > { %3632 = vmatmul.mubr.f32.gmra.mrb[20].mxu1 %v3272_v32 }
 0x2d4   : > { %3637 = vmatprep.mubr.f32.mxu1 %v5874_v8 }
 0x2d5   : > { %v2306_v18 = vpop.permute.xlu0 %2305 }
 0x2d6   : > { %v2337_v4 = vadd.f32 %v5879_v36, %v2306_v18  ;;  %v2338_v2 = vadd.f32 %v5880_v33, %v2306_v18  ;;  %v5884_v36 = vld [vmem:[#allocation7_spill] sm:$0xff] }
 0x2d7   : > { %3641 = vmatmul.mubr.f32.gmra.mrb[22].mxu1 %v3283_v6 }
 0x2d8   : > { %3735 = vmatprep.mubr.f32.mxu1 %v5874_v8  ;;  %v4134_v52 = vmul.f32 -1.442695, %v2338_v2 }
 0x2d9   : > { %v3872_v21 = vpop.permute.xlu0 %3871 }
 0x2db   : > { %3737 = vmatmul.mubr.f32.vlgmr.msra.gmra.mrb[16].mxu1 %v5688_v3 }
 0x2dc   : > { %3742 = vmatprep.mubr.f32.mxu1 %v5874_v8  ;;  %4338 = vmatpush1.bf16.msra.mxu1 %v5091_v30  ;;  %v2333_v30 = vadd.f32 %v5483_v23, %v2296_v51  ;;  %v4133_v23 = vmul.f32 -1.442695, %v2337_v4 }
 0x2dd   : > { %4340 = vmatprep.subr.bf16.mxu1 %v5093_v42  ;;  %v2334_v42 = vadd.f32 %v5485_v54, %v2296_v51  ;;  %v5881_v54 = vld [vmem:[#allocation4_spill] sm:$0xff]  ;;  %v3882_v55 = vpop.permute.xlu0 %3881 }
 0x2de   : > { %v4129_v47 = vmul.f32 -1.442695, %v2333_v30 }
 0x2df   : > { %3744 = vmatmul.mubr.f32.gmra.mrb[18].mxu1 %v5699_v10  ;;  %v4130_v56 = vmul.f32 -1.442695, %v2334_v42 }
 0x2e0   : > { %3749 = vmatprep.mubr.f32.mxu1 %v5874_v8  ;;  %4342 = vmatpush1.bf16.msra.mxu1 %v5100_v60  ;;  %v2301_v60 = vpop.permute.xlu1 %2300  ;;  %4667 = vpow2.f32 %v4129_v47  ;;  %v5883_v47 = vld [vmem:[#allocation6_spill] sm:$0xff] }
 0x2e1   : > { %v2335_v12 = vadd.f32 %v5487_v20, %v2301_v60  ;;  %v2336_v24 = vadd.f32 %v5489_v9, %v2301_v60  ;;  %4669 = vpow2.f32 %v4130_v56  ;;  %v5882_v20 = vld [vmem:[#allocation5_spill] sm:$0xff] }
 0x2e3   : > { %3751 = vmatmul.mubr.f32.gmra.mrb[20].mxu1 %v5713_v26  ;;  %v4131_v22 = vmul.f32 -1.442695, %v2335_v12  ;;  %v4132_v53 = vmul.f32 -1.442695, %v2336_v24 }
 0x2e4   : > { %3756 = vmatprep.mubr.f32.mxu1 %v5874_v8  ;;  %v2311_v46 = vpop.permute.xlu1 %2310 }
 0x2e5   : > { %4671 = vpow2.f32 %v4131_v22  ;;  %v2339_v13 = vadd.f32 %v5881_v54, %v2311_v46  ;;  %v2340_v38 = vadd.f32 %v5882_v20, %v2311_v46  ;;  %v5885_v20 = vld [vmem:[#allocation8_spill] sm:$0xff] }
 0x2e6   : > { %4673 = vpow2.f32 %v4132_v53 }
 0x2e7   : > { %3758 = vmatmul.mubr.f32.gmra.mrb[22].mxu1 %v5723_v57  ;;  %4675 = vpow2.f32 %v4133_v23  ;;  %v4135_v9 = vmul.f32 -1.442695, %v2339_v13  ;;  %v4136_v1 = vmul.f32 -1.442695, %v2340_v38 }
 0x2e8   : > { %3836 = vmatprep.mubr.f32.mxu1 %v5874_v8  ;;  %4677 = vpow2.f32 %v4134_v52 }
 0x2e9   : > { %4679 = vpow2.f32 %v4135_v9 }
 0x2ea   : > { %v4668_v58 = vpop.eup %4667  ;;  %4681 = vpow2.f32 %v4136_v1 }
 0x2eb   : > { %3838 = vmatmul.mubr.f32.vlgmr.msra.gmra.mrb[16].mxu1 %v5688_v3  ;;  %v4670_v25 = vpop.eup %4669 }
 0x2ec   : > { %3843 = vmatprep.mubr.f32.mxu1 %v5874_v8  ;;  %v2374_v59 = vadd.f32 1.0, %v4670_v25 }
 0x2ef   : > { %3845 = vmatmul.mubr.f32.gmra.mrb[18].mxu1 %v5699_v10  ;;  %v4672_v35 = vpop.eup %4671  ;;  %v3877_v10 = vpop.permute.xlu1 %3876 }
 0x2f0   : > { %3850 = vmatprep.mubr.f32.mxu1 %v5874_v8  ;;  %v4674_v40 = vpop.eup %4673  ;;  %v2375_v43 = vadd.f32 1.0, %v4672_v35 }
 0x2f1   : > { %v4676_v27 = vpop.eup %4675  ;;  %v2376_v11 = vadd.f32 1.0, %v4674_v40 }
 0x2f2   : > { %v4678_v62 = vpop.eup %4677  ;;  %v2377_v45 = vadd.f32 1.0, %v4676_v27 }
 0x2f3   : > { %3852 = vmatmul.mubr.f32.gmra.mrb[20].mxu1 %v5713_v26  ;;  %v4680_v3 = vpop.eup %4679  ;;  %v2378_v17 = vadd.f32 1.0, %v4678_v62  ;;  %v3887_v28 = vpop.permute.xlu1 %3886 }
 0x2f4   : > { %3857 = vmatprep.mubr.f32.mxu1 %v5874_v8  ;;  %v2373_v8 = vadd.f32 1.0, %v4668_v58  ;;  %v4682_v0 = vpop.eup %4681  ;;  %v2379_v19 = vadd.f32 1.0, %v4680_v3 }
 0x2f5   : > { %v2380_v26 = vadd.f32 1.0, %v4682_v0 }
 0x2f6   : > { %4683 = vrcp.f32 %v2373_v8  ;;  %v5886_v8 = vld [vmem:[#allocation9_spill] sm:$0xff] }
 0x2f7   : > { %3859 = vmatmul.mubr.f32.gmra.mrb[22].mxu1 %v5723_v57  ;;  %4685 = vrcp.f32 %v2374_v59 }
 0x2f8   : > { %4687 = vrcp.f32 %v2375_v43 }
 0x2f9   : > { %4689 = vrcp.f32 %v2376_v11 }
 0x300   : > { %v4684_v31 = vpop.eup %4683 }
 0x301   : > { %v4686_v16 = vpop.eup %4685  ;;  %v3905_v32 = vsub.f32 1.0, %v4684_v31 }
 0x302   : > { %v4688_v50 = vpop.eup %4687  ;;  %v3906_v34 = vsub.f32 1.0, %v4686_v16 }
 0x303   : > { %v4690_v6 = vpop.eup %4689  ;;  %v3907_v60 = vsub.f32 1.0, %v4688_v50  ;;  %v3913_v12 = vmul.f32 %v5883_v47, %v3905_v32 }
 0x304   : > { %v3908_v22 = vsub.f32 1.0, %v4690_v6  ;;  %v3914_v4 = vmul.f32 %v5884_v36, %v3906_v34 }
 0x305   : > { %v3915_v38 = vmul.f32 %v5885_v20, %v3907_v60 }
 0x306   : > { %v3916_v35 = vmul.f32 %v5886_v8, %v3908_v22 }
 0x3be   : > { %v3839_v49 = vpop.f32.mrb[16].mxu1 }
 0x3bf   : > { %v3889_v7 = vadd.f32 %v3872_v21, %v3839_v49  ;;  %v3841_v37 = vpop.f32.mrb[17].mxu1 }
 0x3c0   : > { %v3890_v63 = vadd.f32 %v3872_v21, %v3841_v37 }
 0x3c1   : > { %4691 = vtanh.f32 %v3889_v7 }
 0x3c2   : > { %4693 = vtanh.f32 %v3890_v63  ;;  %v3846_v29 = vpop.f32.mrb[18].mxu1  ;;  %v5888_v63 = vld [vmem:[#allocation11_spill] sm:$0xff] }
 0x3c3   : > { %4695 = vrcp.f32 %v2377_v45  ;;  %v3891_v41 = vadd.f32 %v3877_v10, %v3846_v29  ;;  %v3848_v61 = vpop.f32.mrb[19].mxu1  ;;  %v5887_v45 = vld [vmem:[#allocation10_spill] sm:$0xff] }
 0x3c4   : > { %4697 = vrcp.f32 %v2378_v17  ;;  %v3892_v15 = vadd.f32 %v3877_v10, %v3848_v61 }
 0x3c5   : > { %4699 = vtanh.f32 %v3891_v41 }
 0x3c6   : > { %4701 = vtanh.f32 %v3892_v15  ;;  %v3853_v57 = vpop.f32.mrb[20].mxu1  ;;  %v5889_v15 = vld [vmem:[#allocation12_spill] sm:$0xff] }
 0x3c7   : > { %4703 = vrcp.f32 %v2379_v19  ;;  %v3893_v39 = vadd.f32 %v3882_v55, %v3853_v57  ;;  %v3855_v5 = vpop.f32.mrb[21].mxu1  ;;  %v5890_v57 = vld [vmem:[#allocation13_spill] sm:$0xff] }
 0x3c8   : > { %4705 = vrcp.f32 %v2380_v26  ;;  %v3894_v44 = vadd.f32 %v3882_v55, %v3855_v5 }
 0x3c9   : > { %4707 = vtanh.f32 %v3893_v39 }
 0x3ca   : > { %4709 = vtanh.f32 %v3894_v44  ;;  %v3860_v14 = vpop.f32.mrb[22].mxu1 }
 0x3cb   : > { %v4692_v48 = vpop.eup %4691  ;;  %v3895_v51 = vadd.f32 %v3887_v28, %v3860_v14  ;;  %v3862_v30 = vpop.f32.mrb[23].mxu1 }
 0x3cc   : > { %v4694_v42 = vpop.eup %4693  ;;  %v3921_v56 = vmul.f32 %v4692_v48, %v4684_v31  ;;  %v3896_v24 = vadd.f32 %v3887_v28, %v3862_v30 }
 0x3cd   : > { %v4696_v18 = vpop.eup %4695  ;;  %v3922_v53 = vmul.f32 %v4694_v42, %v4686_v16  ;;  %4711 = vtanh.f32 %v3895_v51 }
 0x3ce   : > { %v4698_v33 = vpop.eup %4697  ;;  %v3929_v2 = vadd.f32 %v3921_v56, %v3913_v12  ;;  %4713 = vtanh.f32 %v3896_v24  ;;  %v3909_v13 = vsub.f32 1.0, %v4696_v18 }
 0x3cf   : > { %v4700_v46 = vpop.eup %4699  ;;  %v3930_v23 = vadd.f32 %v3922_v53, %v3914_v4  ;;  %v3910_v58 = vsub.f32 1.0, %v4698_v33 }
 0x3d0   : > { %v4702_v54 = vpop.eup %4701  ;;  %3937 = vst [vmem:[%s5799_s29] sm:$0xff] %v3929_v2  ;;  %v3945_v52 = vmax.f32 %v3929_v2, 0.0  ;;  %v3923_v9 = vmul.f32 %v4700_v46, %v4688_v50  ;;  %v3917_v7 = vmul.f32 %v5887_v45, %v3909_v13 }
 0x3d1   : > { %v4704_v1 = vpop.eup %4703  ;;  %3938 = vst [vmem:[%s5799_s29 + $0x8] sm:$0xff] %v3930_v23  ;;  %v3946_v25 = vmax.f32 %v3930_v23, 0.0  ;;  %v3924_v59 = vmul.f32 %v4702_v54, %v4690_v6  ;;  %v3918_v0 = vmul.f32 %v5888_v63, %v3910_v58 }
 0x3d2   : > { %v4706_v40 = vpop.eup %4705  ;;  %3953 = vst [vmem:[%s5806_s14] sm:$0xff] %v3945_v52  ;;  %v3931_v43 = vadd.f32 %v3923_v9, %v3915_v38  ;;  %v3911_v21 = vsub.f32 1.0, %v4704_v1 }
 0x3d3   : > { %v4708_v27 = vpop.eup %4707  ;;  %3954 = vst [vmem:[%s5806_s14 + $0x8] sm:$0xff] %v3946_v25  ;;  %v3932_v11 = vadd.f32 %v3924_v59, %v3916_v35  ;;  %v3912_v3 = vsub.f32 1.0, %v4706_v40 }
 0x3d4   : > { %v4710_v62 = vpop.eup %4709  ;;  %3939 = vst [vmem:[%s5799_s29 + $0x10] sm:$0xff] %v3931_v43  ;;  %v3947_v49 = vmax.f32 %v3931_v43, 0.0  ;;  %v3925_v37 = vmul.f32 %v4708_v27, %v4696_v18  ;;  %v3919_v31 = vmul.f32 %v5889_v15, %v3911_v21 }
 0x3d5   : > { %3940 = vst [vmem:[%s5799_s29 + $0x18] sm:$0xff] %v3932_v11  ;;  %v3948_v17 = vmax.f32 %v3932_v11, 0.0  ;;  %v3926_v10 = vmul.f32 %v4710_v62, %v4698_v33  ;;  %v3920_v39 = vmul.f32 %v5890_v57, %v3912_v3 }
 0x3d6   : > { %3955 = vst [vmem:[%s5806_s14 + $0x10] sm:$0xff] %v3947_v49  ;;  %v3933_v29 = vadd.f32 %v3925_v37, %v3917_v7 }
 0x3d7   : > { %v4712_v19 = vpop.eup %4711  ;;  %3956 = vst [vmem:[%s5806_s14 + $0x18] sm:$0xff] %v3948_v17  ;;  %v3934_v41 = vadd.f32 %v3926_v10, %v3918_v0 }
 0x3d8   : > { %v4714_v61 = vpop.eup %4713  ;;  %3941 = vst [vmem:[%s5799_s29 + $0x20] sm:$0xff] %v3933_v29  ;;  %v3949_v26 = vmax.f32 %v3933_v29, 0.0  ;;  %v3927_v16 = vmul.f32 %v4712_v19, %v4704_v1 }
 0x3d9   : > { %3942 = vst [vmem:[%s5799_s29 + $0x28] sm:$0xff] %v3934_v41  ;;  %v3950_v55 = vmax.f32 %v3934_v41, 0.0  ;;  %v3928_v5 = vmul.f32 %v4714_v61, %v4706_v40 }
 0x3da   : > { %3957 = vst [vmem:[%s5806_s14 + $0x20] sm:$0xff] %v3949_v26  ;;  %v3935_v32 = vadd.f32 %v3927_v16, %v3919_v31 }
 0x3db   : > { %3958 = vst [vmem:[%s5806_s14 + $0x28] sm:$0xff] %v3950_v55  ;;  %v3936_v44 = vadd.f32 %v3928_v5, %v3920_v39 }
 0x3dc   : > { %3943 = vst [vmem:[%s5799_s29 + $0x30] sm:$0xff] %v3935_v32  ;;  %v3951_v50 = vmax.f32 %v3935_v32, 0.0 }
 0x3dd   : > { %3944 = vst [vmem:[%s5799_s29 + $0x38] sm:$0xff] %v3936_v44  ;;  %v3952_v34 = vmax.f32 %v3936_v44, 0.0 }
 0x3de   : > { %3959 = vst [vmem:[%s5806_s14 + $0x30] sm:$0xff] %v3951_v50 }
 0x3df   : > { %3960 = vst [vmem:[%s5806_s14 + $0x38] sm:$0xff] %v3952_v34 }
 0x3e0 PF: > { %s20_s11 = sadd.s32 1, %s4745_s11   ;;  %s5891_s30 = smov %s4741_s10 }
 0x3e1   : > { %p17_p5 = scmp.ge.s32.totalorder %s20_s11, 4   ;;  %s5892_s10 = smov %s5894_s12 }
 0x3e3   :  { %19 = sbr.rel (!%p17_p5) target bundleno = 2 (0x2), region = 97 }

// kernel: norm_conv2d_gru_forward.7
= control target key start
LH: loop header
LB: loop body
LE: loop exit
PB: predicated region body
PF: predicated region fallthrough
CT: control target
= control target key end

     0   :  { %s370_s12 = smov 0   ;;  %s393_s0 = inlined_call_operand.vmem [shape: f32[2,2,512], index: 0, kind: input, shape index: {}]   ;;  %s394_s1 = inlined_call_operand.vmem [shape: f32[2,2,1], index: 1, kind: input, shape index: {}]   ;;  %s395_s2 = inlined_call_operand.vmem [shape: f32[2,2,1], index: 2, kind: input, shape index: {}]   ;;  %s396_s3 = inlined_call_operand.vmem [shape: f32[2,2,512], index: 3, kind: output, shape index: {}]  }
   0x1 LB: > { %s314_s13 = sadd.s32 4294967295, %s346_s12   ;;  %p318_p0 = scmp.ge.s32.totalorder %s346_s12, 1  ;;  %s346_s12 = sphi %s370_s12, %s13_s12  }
   0x2   : > { %p155_p1 = scmp.lt.s32.totalorder %s346_s12, 3 }
   0x4   : > { %p156_p2 = pnand %p318_p0, %p155_p1 }
   0x5   : > { %p187_p3 = scmp.lt.s32.totalorder (!%p156_p2), %s314_s13, 1  ;;  %v348_v0 = vmov (!%p156_p2), 0   ;;  %v349_v3 = vmov (!%p156_p2), 269488144   ;;  %v214_v5 = vlaneseq (!%p156_p2) }
   0x6   : > { %159 = sbr.rel (%p156_p2) target bundleno = 154 (0x9a), region = 32  ;;  %339 = vset.pattern.permute.xlu0 (!%p156_p2), %v348_v0  ;;  %v212_v4 = vunpack.c.l.s4 (!%p156_p2), %v349_v3 }
   0x7   : > { %v215_v7 = vshrl.u32 (!%p156_p2), %v214_v5, 7 }
   0x8   : > { %v213_v6 = vunpack.c.0.s8 (!%p156_p2), %v212_v4 }
   0xa   : > { %v216_v8 = vsub.s32 (!%p156_p2), %v213_v6, %v215_v7 }
   0xd   : > { %s398_s13 = smov (!%p187_p3, %s314_s13), 1 }
   0xe   : > { %s321_s14 = sshll.u32 %s398_s13, 1  ;;  %s327_s21 = sshll.u32 %s398_s13, 3 }
   0xf   : > { %s199_s17 = scalar_lea.vmem %s395_s2, %s321_s14  ;;  %s195_s20 = scalar_lea.vmem %s394_s1, %s321_s14 }
  0x10   : > { %v206_v1 = vld [vmem:[%s199_s17] sm:$0x3]  ;;  %s191_s24 = scalar_lea.vmem %s393_s0, %s327_s21  ;;  %s204_s27 = scalar_lea.vmem %s396_s3, %s327_s21 }
  0x11   : > { %209 = vperm.xlu0 %339, %v206_v1   ;;  %v220_v2 = vld [vmem:[%s195_s20] sm:$0x3] }
  0x12   : > { %v205_v11 = vld [vmem:[%s191_s24] sm:$0xff] }
  0x15   : > { %223 = vperm.xlu0 %339, %v220_v2  }
  0x90   : > { %v210_v9 = vpop.permute.xlu0 %209 }
  0x91   : > { %v217_v10 = vrot.slane %v210_v9, %v216_v8 }
  0x93   : > { %v219_v13 = vmul.f32 %v217_v10, %v205_v11 }
  0x94   : > { %v224_v12 = vpop.permute.xlu0 %223 }
  0x95   : > { %v231_v14 = vrot.slane %v224_v12, %v216_v8 }
  0x97   : > { %v233_v15 = vadd.f32 %v231_v14, %v219_v13 }
  0x99   : > { %234 = vst [vmem:[%s204_s27] sm:$0xff] %v233_v15 }
  0x9a PF: > { %s13_s12 = sadd.s32 1, %s346_s12  }
  0x9b   : > { %p10_p4 = scmp.ge.s32.totalorder %s13_s12, 4  }
  0x9d   :  { %12 = sbr.rel (!%p10_p4) target bundleno = 1 (0x1), region = 68 }

</bundles_post_ra>
